<compile_context>
chip_gen: v6e
topology: v6e:2x2x1
jax: 0.10.0
libtpu: 0.0.40
codegen_flags: <defaults>
</compile_context>

<pallas_src>
import jax
import jax.numpy as jnp
from jax.experimental import pallas as pl
from jax.experimental.pallas import tpu as pltpu

IN_FEATURES = 6670
HIDDEN = 100

LANE = 128
SUBLANE = 8


def _round_up(x, m):
    return ((x + m - 1) // m) * m


K_PAD = _round_up(IN_FEATURES, LANE)   # 6784 = 53 * 128
H_PAD = _round_up(HIDDEN, LANE)        # 128


def mlp_kernel(x_ref,
               w1_ref, b1_ref,
               w2_ref, b2_ref,
               w3_ref, b3_ref,
               w4_ref, b4_ref,
               w5_ref, b5_ref,
               o_ref):
    # Single fused pass per batch tile: 5 bf16 MXU matmuls with f32 accumulation,
    # bias-add/ReLU on the VPU in f32, activations re-cast to bf16 between layers.
    h = jnp.dot(x_ref[...], w1_ref[...],
                preferred_element_type=jnp.float32) + b1_ref[...]   # drop1: identity (eval)
    h = jnp.maximum(h, 0.0).astype(jnp.bfloat16)
    h = jnp.dot(h, w2_ref[...],
                preferred_element_type=jnp.float32) + b2_ref[...]   # drop2: identity (eval)
    h = jnp.maximum(h, 0.0).astype(jnp.bfloat16)
    h = jnp.dot(h, w3_ref[...],
                preferred_element_type=jnp.float32) + b3_ref[...]   # drop3: identity (eval)
    h = jnp.maximum(h, 0.0).astype(jnp.bfloat16)
    h = jnp.dot(h, w4_ref[...],
                preferred_element_type=jnp.float32) + b4_ref[...]   # drop4: identity (eval)
    h = jnp.maximum(h, 0.0).astype(jnp.bfloat16)
    o_ref[...] = (jnp.dot(h, w5_ref[...],                           # drop5: identity (eval)
                          preferred_element_type=jnp.float32) + b5_ref[...]
                  ).astype(o_ref.dtype)


def _choose_tile_b(batch):
    if batch >= 256:
        return 256
    return max(SUBLANE, _round_up(batch, SUBLANE))


def _pad_and_cast_params(params):
    """Zero-pad (in, out) weights / (1, out) biases to lane-aligned shapes.

    Weights -> bfloat16, biases stay float32 (added after the f32 accumulation).
    Zero padding is exact: padded output lanes get 0*x + 0 = 0, ReLU(0) = 0, and
    padded input rows of the next weight matrix are also 0.
    """
    flat = []
    for (w, b) in params:
        fan_in, fan_out = w.shape
        in_pad = _round_up(fan_in, LANE)
        out_pad = _round_up(fan_out, LANE)
        w_p = jnp.pad(w, ((0, in_pad - fan_in), (0, out_pad - fan_out))
                      ).astype(jnp.bfloat16)
        b_p = jnp.pad(b, ((0, 0), (0, out_pad - fan_out))).astype(jnp.float32)
        flat += [w_p, b_p]
    return flat


def mlp_forward(x, params):
    """x: (B, 6670) f32. params: list of (w, b) with w: (in, out), b: (1, out)."""
    B = x.shape[0]
    num_classes = params[-1][0].shape[1]
    out_pad = _round_up(num_classes, LANE)

    tb = _choose_tile_b(B)
    b_pad = _round_up(B, tb)
    n_tiles = b_pad // tb

    # Pad + cast inputs/weights (done once outside the kernel).
    x_p = jnp.pad(x, ((0, b_pad - B), (0, K_PAD - IN_FEATURES))
                  ).astype(jnp.bfloat16)
    flat_params = _pad_and_cast_params(params)

    def tiled_spec(shape):
        # Batch-tiled arrays (x, out): block index advances with the grid.
        return pl.BlockSpec(shape, lambda i: (0, 0) if shape[0] != tb else (i, 0))

    # x / out stream over the batch grid; weights & biases use a constant
    # index_map so they are fetched once and stay VMEM-resident.
    x_spec = pl.BlockSpec((tb, K_PAD), lambda i: (i, 0))
    param_specs = [pl.BlockSpec(p.shape, lambda i: (0, 0)) for p in flat_params]
    out_spec = pl.BlockSpec((tb, out_pad), lambda i: (i, 0))

    # Advisory cost estimate (helps XLA overlap surrounding ops).
    flops = 2 * b_pad * (K_PAD * H_PAD + 3 * H_PAD * H_PAD + H_PAD * out_pad)
    bytes_accessed = (x_p.size * 2
                      + sum(int(p.size) * p.dtype.itemsize for p in flat_params)
                      + b_pad * out_pad * 4)
    cost = pl.CostEstimate(flops=flops, transcendentals=0,
                           bytes_accessed=bytes_accessed)

    out_padded = pl.pallas_call(
        mlp_kernel,
        out_shape=jax.ShapeDtypeStruct((b_pad, out_pad), jnp.float32),
        grid_spec=pltpu.PrefetchScalarGridSpec(
            num_scalar_prefetch=0,
            grid=(n_tiles,),
            in_specs=[x_spec] + param_specs,
            out_specs=out_spec,
        ),
        compiler_params=pltpu.CompilerParams(
            dimension_semantics=("parallel",),
            vmem_limit_bytes=32 << 20,
        ),
        cost_estimate=cost,
    )(x_p, *flat_params)

    return out_padded[:B, :num_classes]


def init_params(key, num_classes):
    """Deterministic init matching nn.Linear shapes (weights stored as (in, out))."""
    dims = [(IN_FEATURES, HIDDEN), (HIDDEN, HIDDEN), (HIDDEN, HIDDEN),
            (HIDDEN, HIDDEN), (HIDDEN, num_classes)]
    params = []
    for (fan_in, fan_out) in dims:
        key, kw, kb = jax.random.split(key, 3)
        bound = 1.0 / jnp.sqrt(fan_in)
        w = jax.random.uniform(kw, (fan_in, fan_out), jnp.float32, -bound, bound)
        b = jax.random.uniform(kb, (1, fan_out), jnp.float32, -bound, bound)
        params.append((w, b))
    return params


def reference_forward(x, params):
    h = x
    for i, (w, b) in enumerate(params):
        h = h @ w + b
        if i < len(params) - 1:
            h = jnp.maximum(h, 0.0)
    return h


if __name__ == "__main__":
    num_classes = 10
    batch = 4

    key = jax.random.PRNGKey(0)
    key, kx = jax.random.split(key)
    x = jax.random.normal(kx, (batch, IN_FEATURES), jnp.float32)
    params = init_params(key, num_classes)

    out = mlp_forward(x, params)
    out = jax.block_until_ready(out)

    ref = reference_forward(x, params)
    assert out.shape == (batch, num_classes)
    # bf16 weights/activations with f32 accumulation -> looser tolerance vs f32 ref.
    assert jnp.allclose(out, ref, atol=5e-2, rtol=5e-2), "mismatch vs JAX reference"

    print("KERNEL_OK")
</pallas_src>

<mosaic_0001>
module attributes {stable_mosaic.version = 11 : i64} {
  func.func @mlp_kernel(%arg0: i32, %arg1: memref<8x6784xbf16, #tpu.memory_space<vmem>>, %arg2: memref<6784x128xbf16, #tpu.memory_space<vmem>>, %arg3: memref<1x128xf32, #tpu.memory_space<vmem>>, %arg4: memref<128x128xbf16, #tpu.memory_space<vmem>>, %arg5: memref<1x128xf32, #tpu.memory_space<vmem>>, %arg6: memref<128x128xbf16, #tpu.memory_space<vmem>>, %arg7: memref<1x128xf32, #tpu.memory_space<vmem>>, %arg8: memref<128x128xbf16, #tpu.memory_space<vmem>>, %arg9: memref<1x128xf32, #tpu.memory_space<vmem>>, %arg10: memref<128x128xbf16, #tpu.memory_space<vmem>>, %arg11: memref<1x128xf32, #tpu.memory_space<vmem>>, %arg12: memref<8x128xf32, #tpu.memory_space<vmem>>) attributes {dimension_semantics = [#tpu.dimension_semantics<parallel>], iteration_bounds = array<i64: 1>, scalar_prefetch = 0 : i64, scratch_operands = 0 : i64, tpu.core_type = #tpu.core_type<tc>, window_params = [{transform_indices = @transform_0, window_bounds = array<i64: 8, 6784>}, {pipeline_mode = #tpu.pipeline_mode<synchronous>, transform_indices = @transform_1, window_bounds = array<i64: 6784, 128>}, {pipeline_mode = #tpu.pipeline_mode<synchronous>, transform_indices = @transform_2, window_bounds = array<i64: 1, 128>}, {pipeline_mode = #tpu.pipeline_mode<synchronous>, transform_indices = @transform_3, window_bounds = array<i64: 128, 128>}, {pipeline_mode = #tpu.pipeline_mode<synchronous>, transform_indices = @transform_4, window_bounds = array<i64: 1, 128>}, {pipeline_mode = #tpu.pipeline_mode<synchronous>, transform_indices = @transform_5, window_bounds = array<i64: 128, 128>}, {pipeline_mode = #tpu.pipeline_mode<synchronous>, transform_indices = @transform_6, window_bounds = array<i64: 1, 128>}, {pipeline_mode = #tpu.pipeline_mode<synchronous>, transform_indices = @transform_7, window_bounds = array<i64: 128, 128>}, {pipeline_mode = #tpu.pipeline_mode<synchronous>, transform_indices = @transform_8, window_bounds = array<i64: 1, 128>}, {pipeline_mode = #tpu.pipeline_mode<synchronous>, transform_indices = @transform_9, window_bounds = array<i64: 128, 128>}, {pipeline_mode = #tpu.pipeline_mode<synchronous>, transform_indices = @transform_10, window_bounds = array<i64: 1, 128>}, {transform_indices = @transform_11, window_bounds = array<i64: 8, 128>}]} {
    %c0 = arith.constant 0 : index
    %c0_0 = arith.constant 0 : index
    %0 = vector.load %arg1[%c0, %c0_0] : memref<8x6784xbf16, #tpu.memory_space<vmem>>, vector<8x6784xbf16>
    %c0_1 = arith.constant 0 : index
    %c0_2 = arith.constant 0 : index
    %1 = vector.load %arg2[%c0_1, %c0_2] : memref<6784x128xbf16, #tpu.memory_space<vmem>>, vector<6784x128xbf16>
    %cst = arith.constant dense<0.000000e+00> : vector<8x128xf32>
    %2 = tpu.matmul %0, %1, %cst {dimension_numbers = #tpu.dot_dimension_numbers<[1], [0], [0], [1], [0, 0, 1, 1], [], []>} : vector<8x6784xbf16>, vector<6784x128xbf16>, vector<8x128xf32> -> vector<8x128xf32>
    %c0_3 = arith.constant 0 : index
    %c0_4 = arith.constant 0 : index
    %3 = vector.load %arg3[%c0_3, %c0_4] : memref<1x128xf32, #tpu.memory_space<vmem>>, vector<1x128xf32>
    %4 = vector.broadcast %3 : vector<1x128xf32> to vector<8x128xf32>
    %5 = arith.addf %2, %4 : vector<8x128xf32>
    %cst_5 = arith.constant 0.000000e+00 : f32
    %6 = vector.broadcast %cst_5 : f32 to vector<8x128xf32>
    %7 = arith.maximumf %5, %6 : vector<8x128xf32>
    %8 = arith.truncf %7 : vector<8x128xf32> to vector<8x128xbf16>
    %c0_6 = arith.constant 0 : index
    %c0_7 = arith.constant 0 : index
    %9 = vector.load %arg4[%c0_6, %c0_7] : memref<128x128xbf16, #tpu.memory_space<vmem>>, vector<128x128xbf16>
    %cst_8 = arith.constant dense<0.000000e+00> : vector<8x128xf32>
    %10 = tpu.matmul %8, %9, %cst_8 {dimension_numbers = #tpu.dot_dimension_numbers<[1], [0], [0], [1], [0, 0, 1, 1], [], []>} : vector<8x128xbf16>, vector<128x128xbf16>, vector<8x128xf32> -> vector<8x128xf32>
    %c0_9 = arith.constant 0 : index
    %c0_10 = arith.constant 0 : index
    %11 = vector.load %arg5[%c0_9, %c0_10] : memref<1x128xf32, #tpu.memory_space<vmem>>, vector<1x128xf32>
    %12 = vector.broadcast %11 : vector<1x128xf32> to vector<8x128xf32>
    %13 = arith.addf %10, %12 : vector<8x128xf32>
    %cst_11 = arith.constant 0.000000e+00 : f32
    %14 = vector.broadcast %cst_11 : f32 to vector<8x128xf32>
    %15 = arith.maximumf %13, %14 : vector<8x128xf32>
    %16 = arith.truncf %15 : vector<8x128xf32> to vector<8x128xbf16>
    %c0_12 = arith.constant 0 : index
    %c0_13 = arith.constant 0 : index
    %17 = vector.load %arg6[%c0_12, %c0_13] : memref<128x128xbf16, #tpu.memory_space<vmem>>, vector<128x128xbf16>
    %cst_14 = arith.constant dense<0.000000e+00> : vector<8x128xf32>
    %18 = tpu.matmul %16, %17, %cst_14 {dimension_numbers = #tpu.dot_dimension_numbers<[1], [0], [0], [1], [0, 0, 1, 1], [], []>} : vector<8x128xbf16>, vector<128x128xbf16>, vector<8x128xf32> -> vector<8x128xf32>
    %c0_15 = arith.constant 0 : index
    %c0_16 = arith.constant 0 : index
    %19 = vector.load %arg7[%c0_15, %c0_16] : memref<1x128xf32, #tpu.memory_space<vmem>>, vector<1x128xf32>
    %20 = vector.broadcast %19 : vector<1x128xf32> to vector<8x128xf32>
    %21 = arith.addf %18, %20 : vector<8x128xf32>
    %cst_17 = arith.constant 0.000000e+00 : f32
    %22 = vector.broadcast %cst_17 : f32 to vector<8x128xf32>
    %23 = arith.maximumf %21, %22 : vector<8x128xf32>
    %24 = arith.truncf %23 : vector<8x128xf32> to vector<8x128xbf16>
    %c0_18 = arith.constant 0 : index
    %c0_19 = arith.constant 0 : index
    %25 = vector.load %arg8[%c0_18, %c0_19] : memref<128x128xbf16, #tpu.memory_space<vmem>>, vector<128x128xbf16>
    %cst_20 = arith.constant dense<0.000000e+00> : vector<8x128xf32>
    %26 = tpu.matmul %24, %25, %cst_20 {dimension_numbers = #tpu.dot_dimension_numbers<[1], [0], [0], [1], [0, 0, 1, 1], [], []>} : vector<8x128xbf16>, vector<128x128xbf16>, vector<8x128xf32> -> vector<8x128xf32>
    %c0_21 = arith.constant 0 : index
    %c0_22 = arith.constant 0 : index
    %27 = vector.load %arg9[%c0_21, %c0_22] : memref<1x128xf32, #tpu.memory_space<vmem>>, vector<1x128xf32>
    %28 = vector.broadcast %27 : vector<1x128xf32> to vector<8x128xf32>
    %29 = arith.addf %26, %28 : vector<8x128xf32>
    %cst_23 = arith.constant 0.000000e+00 : f32
    %30 = vector.broadcast %cst_23 : f32 to vector<8x128xf32>
    %31 = arith.maximumf %29, %30 : vector<8x128xf32>
    %32 = arith.truncf %31 : vector<8x128xf32> to vector<8x128xbf16>
    %c0_24 = arith.constant 0 : index
    %c0_25 = arith.constant 0 : index
    %33 = vector.load %arg10[%c0_24, %c0_25] : memref<128x128xbf16, #tpu.memory_space<vmem>>, vector<128x128xbf16>
    %cst_26 = arith.constant dense<0.000000e+00> : vector<8x128xf32>
    %34 = tpu.matmul %32, %33, %cst_26 {dimension_numbers = #tpu.dot_dimension_numbers<[1], [0], [0], [1], [0, 0, 1, 1], [], []>} : vector<8x128xbf16>, vector<128x128xbf16>, vector<8x128xf32> -> vector<8x128xf32>
    %c0_27 = arith.constant 0 : index
    %c0_28 = arith.constant 0 : index
    %35 = vector.load %arg11[%c0_27, %c0_28] : memref<1x128xf32, #tpu.memory_space<vmem>>, vector<1x128xf32>
    %36 = vector.broadcast %35 : vector<1x128xf32> to vector<8x128xf32>
    %37 = arith.addf %34, %36 : vector<8x128xf32>
    %c0_29 = arith.constant 0 : index
    %c0_30 = arith.constant 0 : index
    %38 = vector.load %arg12[%c0_29, %c0_30] : memref<8x128xf32, #tpu.memory_space<vmem>>, vector<8x128xf32>
    tpu.vector_store %arg12[%c0_29, %c0_30], %37 {strides = array<i32>} : memref<8x128xf32, #tpu.memory_space<vmem>>, vector<8x128xf32>,
    return
  }
  func.func @transform_0(%arg0: i32) -> (i32, i32) {
    %c0_i32 = arith.constant 0 : i32
    %c0_i32_0 = arith.constant 0 : i32
    return %arg0, %c0_i32 : i32, i32
  }
  func.func @transform_1(%arg0: i32) -> (i32, i32) {
    %c0_i32 = arith.constant 0 : i32
    %c0_i32_0 = arith.constant 0 : i32
    %c0_i32_1 = arith.constant 0 : i32
    return %c0_i32, %c0_i32_0 : i32, i32
  }
  func.func @transform_2(%arg0: i32) -> (i32, i32) {
    %c0_i32 = arith.constant 0 : i32
    %c0_i32_0 = arith.constant 0 : i32
    %c0_i32_1 = arith.constant 0 : i32
    return %c0_i32, %c0_i32_0 : i32, i32
  }
  func.func @transform_3(%arg0: i32) -> (i32, i32) {
    %c0_i32 = arith.constant 0 : i32
    %c0_i32_0 = arith.constant 0 : i32
    %c0_i32_1 = arith.constant 0 : i32
    return %c0_i32, %c0_i32_0 : i32, i32
  }
  func.func @transform_4(%arg0: i32) -> (i32, i32) {
    %c0_i32 = arith.constant 0 : i32
    %c0_i32_0 = arith.constant 0 : i32
    %c0_i32_1 = arith.constant 0 : i32
    return %c0_i32, %c0_i32_0 : i32, i32
  }
  func.func @transform_5(%arg0: i32) -> (i32, i32) {
    %c0_i32 = arith.constant 0 : i32
    %c0_i32_0 = arith.constant 0 : i32
    %c0_i32_1 = arith.constant 0 : i32
    return %c0_i32, %c0_i32_0 : i32, i32
  }
  func.func @transform_6(%arg0: i32) -> (i32, i32) {
    %c0_i32 = arith.constant 0 : i32
    %c0_i32_0 = arith.constant 0 : i32
    %c0_i32_1 = arith.constant 0 : i32
    return %c0_i32, %c0_i32_0 : i32, i32
  }
  func.func @transform_7(%arg0: i32) -> (i32, i32) {
    %c0_i32 = arith.constant 0 : i32
    %c0_i32_0 = arith.constant 0 : i32
    %c0_i32_1 = arith.constant 0 : i32
    return %c0_i32, %c0_i32_0 : i32, i32
  }
  func.func @transform_8(%arg0: i32) -> (i32, i32) {
    %c0_i32 = arith.constant 0 : i32
    %c0_i32_0 = arith.constant 0 : i32
    %c0_i32_1 = arith.constant 0 : i32
    return %c0_i32, %c0_i32_0 : i32, i32
  }
  func.func @transform_9(%arg0: i32) -> (i32, i32) {
    %c0_i32 = arith.constant 0 : i32
    %c0_i32_0 = arith.constant 0 : i32
    %c0_i32_1 = arith.constant 0 : i32
    return %c0_i32, %c0_i32_0 : i32, i32
  }
  func.func @transform_10(%arg0: i32) -> (i32, i32) {
    %c0_i32 = arith.constant 0 : i32
    %c0_i32_0 = arith.constant 0 : i32
    %c0_i32_1 = arith.constant 0 : i32
    return %c0_i32, %c0_i32_0 : i32, i32
  }
  func.func @transform_11(%arg0: i32) -> (i32, i32) {
    %c0_i32 = arith.constant 0 : i32
    %c0_i32_0 = arith.constant 0 : i32
    return %arg0, %c0_i32 : i32, i32
  }
}

</mosaic_0001>

<bundles_post_ra>
// kernel: tpu_custom_call.1
= control target key start
LH: loop header
LB: loop body
LE: loop exit
PB: predicated region body
PF: predicated region fallthrough
CT: control target
= control target key end

     0   :  { %16 = vsyncpa [#allocation3], 0  ;;  %s7547_s0 = inlined_call_operand.hbm [shape: bf16[8,6784], index: 0, kind: input, shape index: {}]   ;;  %s7548_s1 = inlined_call_operand.hbm [shape: bf16[6784,128], index: 1, kind: input, shape index: {}]   ;;  %s7549_s2 = inlined_call_operand.hbm [shape: f32[1,128], index: 2, kind: input, shape index: {}]   ;;  %s7550_s3 = inlined_call_operand.hbm [shape: bf16[128,128], index: 3, kind: input, shape index: {}]   ;;  %s7551_s4 = inlined_call_operand.hbm [shape: f32[1,128], index: 4, kind: input, shape index: {}]   ;;  %s7552_s5 = inlined_call_operand.hbm [shape: bf16[128,128], index: 5, kind: input, shape index: {}]   ;;  %s7553_s6 = inlined_call_operand.hbm [shape: f32[1,128], index: 6, kind: input, shape index: {}]   ;;  %s7554_s7 = inlined_call_operand.hbm [shape: bf16[128,128], index: 7, kind: input, shape index: {}]   ;;  %s7555_s8 = inlined_call_operand.hbm [shape: f32[1,128], index: 8, kind: input, shape index: {}]   ;;  %s7556_s9 = inlined_call_operand.hbm [shape: bf16[128,128], index: 9, kind: input, shape index: {}]   ;;  %s7557_s10 = inlined_call_operand.hbm [shape: f32[1,128], index: 10, kind: input, shape index: {}]   ;;  %s7558_s11 = inlined_call_operand.hbm [shape: f32[8,128], index: 11, kind: output, shape index: {}]  }
   0x1   :  { %17 = vsyncpa [#allocation6], 0 }
   0x2   :  { %18 = vsyncpa [#allocation9], 0 }
   0x3   :  { %19 = vsyncpa [#allocation12], 0 }
   0x4   :  { %20 = vsyncpa [#allocation15], 0 }
   0x5   :  { %21 = vsyncpa [#allocation18], 0 }
   0x6   :  { %22 = vsyncpa [#allocation4], 0  ;;  %s7352_s17 = smov [#allocation5]  }
   0x7   :  { %s38_s18 = sshll.u32 %s7352_s17, 4  ;;  %s39_s18 = int_to_ptr.vmem [resolvable:$true] %s38_s18 }
   0x8   :  { %s7106_s19 = scalar_lea.vmem %s39_s18, 54272  ;;  %p7111_p1 = scmp.lt.s32.totalorder %s39_s18, %s39_s18 }
   0x9   :  { %p7107_p0 = scmp.ne.s32.totalorder %s39_s18, %s7106_s19  ;;  %p7112_p2 = scmp.lt.s32.totalorder %s7106_s19, %s7106_s19 }
   0xb   :  { %p7113_p3 = por %p7112_p2, %p7111_p1 }
   0xd   :  { %p7114_p4 = pnand %p7113_p3, %p7107_p0 }
   0xf   :  { %7117 = shalt.err (!%p7114_p4)
}
  0x10   :  { %s7353_s20 = smov 64   ;;  %s7354_s21 = smov 4  }
  0x11   :  { %44 = dma.hbm_to_vmem [thread:$0]  %s7548_s1, 54272, %s39_s18, [#allocation6], %s7353_s20, %s7353_s20, %s7354_s21  }
  0x12   :  { %s7355_s24 = smov [#allocation8]   ;;  %s7356_s26 = smov [#allocation11]  }
  0x13   :  { %s60_s25 = sshll.u32 %s7355_s24, 4  ;;  %s82_s27 = sshll.u32 %s7356_s26, 4  ;;  %s61_s25 = int_to_ptr.vmem [resolvable:$true] %s60_s25  ;;  %s83_s27 = int_to_ptr.vmem [resolvable:$true] %s82_s27 }
  0x14   :  { %s7126_s28 = scalar_lea.vmem %s61_s25, 1024  ;;  %p7131_p6 = scmp.lt.s32.totalorder %s61_s25, %s61_s25 }
  0x15   :  { %p7127_p5 = scmp.ne.s32.totalorder %s61_s25, %s7126_s28  ;;  %p7132_p7 = scmp.lt.s32.totalorder %s7126_s28, %s7126_s28 }
  0x17   :  { %p7133_p8 = por %p7132_p7, %p7131_p6 }
  0x19   :  { %p7134_p9 = pnand %p7133_p8, %p7127_p5 }
  0x1b   :  { %7137 = shalt.err (!%p7134_p9)
}
  0x1c   :  { %66 = dma.hbm_to_vmem [thread:$0]  %s7550_s3, 1024, %s61_s25, [#allocation9], %s7353_s20, %s7353_s20, %s7354_s21  }
  0x1d   :  { %s7146_s1 = scalar_lea.vmem %s83_s27, 1024  ;;  %p7151_p11 = scmp.lt.s32.totalorder %s83_s27, %s83_s27 }
  0x1e   :  { %p7147_p10 = scmp.ne.s32.totalorder %s83_s27, %s7146_s1  ;;  %p7152_p12 = scmp.lt.s32.totalorder %s7146_s1, %s7146_s1 }
  0x20   :  { %p7153_p13 = por %p7152_p12, %p7151_p11 }
  0x22   :  { %p7154_p0 = pnand %p7153_p13, %p7147_p10 }
  0x24   :  { %7157 = shalt.err (!%p7154_p0)
}
  0x25   :  { %88 = dma.hbm_to_vmem [thread:$0]  %s7552_s5, 1024, %s83_s27, [#allocation12], %s7353_s20, %s7353_s20, %s7354_s21  }
  0x26   :  { %s7357_s14 = smov [#allocation14]   ;;  %s7358_s16 = smov [#allocation17]  }
  0x27   :  { %s104_s15 = sshll.u32 %s7357_s14, 4  ;;  %s126_s3 = sshll.u32 %s7358_s16, 4  ;;  %s105_s15 = int_to_ptr.vmem [resolvable:$true] %s104_s15  ;;  %s127_s3 = int_to_ptr.vmem [resolvable:$true] %s126_s3 }
  0x28   :  { %s7166_s17 = scalar_lea.vmem %s105_s15, 1024  ;;  %p7171_p2 = scmp.lt.s32.totalorder %s105_s15, %s105_s15 }
  0x29   :  { %p7167_p1 = scmp.ne.s32.totalorder %s105_s15, %s7166_s17  ;;  %p7172_p3 = scmp.lt.s32.totalorder %s7166_s17, %s7166_s17 }
  0x2b   :  { %p7173_p4 = por %p7172_p3, %p7171_p2 }
  0x2d   :  { %p7174_p5 = pnand %p7173_p4, %p7167_p1 }
  0x2f   :  { %7177 = shalt.err (!%p7174_p5)
}
  0x30   :  { %110 = dma.hbm_to_vmem [thread:$0]  %s7554_s7, 1024, %s105_s15, [#allocation15], %s7353_s20, %s7353_s20, %s7354_s21  }
  0x31   :  { %s7186_s5 = scalar_lea.vmem %s127_s3, 1024  ;;  %p7191_p7 = scmp.lt.s32.totalorder %s127_s3, %s127_s3 }
  0x32   :  { %p7187_p6 = scmp.ne.s32.totalorder %s127_s3, %s7186_s5  ;;  %p7192_p8 = scmp.lt.s32.totalorder %s7186_s5, %s7186_s5 }
  0x34   :  { %p7193_p9 = por %p7192_p8, %p7191_p7 }
  0x36   :  { %p7194_p10 = pnand %p7193_p9, %p7187_p6 }
  0x38   :  { %7197 = shalt.err (!%p7194_p10)
}
  0x39   :  { %132 = dma.hbm_to_vmem [thread:$0]  %s7556_s9, 1024, %s127_s3, [#allocation18], %s7353_s20, %s7353_s20, %s7354_s21  }
  0x3a   :  { %s7359_s24 = smov [#allocation2]   ;;  %s7360_s26 = smov [#allocation7]  }
  0x3b   :  { %s29_s25 = sshll.u32 %s7359_s24, 4  ;;  %s51_s7 = sshll.u32 %s7360_s26, 4  ;;  %s30_s25 = int_to_ptr.vmem [resolvable:$true] %s29_s25  ;;  %s52_s7 = int_to_ptr.vmem [resolvable:$true] %s51_s7 }
  0x3c   :  { %s7206_s27 = scalar_lea.vmem %s30_s25, 3392  ;;  %p7211_p12 = scmp.lt.s32.totalorder %s30_s25, %s30_s25 }
  0x3d   :  { %p7207_p11 = scmp.ne.s32.totalorder %s30_s25, %s7206_s27  ;;  %p7212_p13 = scmp.lt.s32.totalorder %s7206_s27, %s7206_s27 }
  0x3f   :  { %p7213_p0 = por %p7212_p13, %p7211_p12 }
  0x41   :  { %p7214_p1 = pnand %p7213_p0, %p7207_p11 }
  0x43   :  { %7217 = shalt.err (!%p7214_p1)
}
  0x44   :  { %32 = dma.hbm_to_vmem [thread:$0]  %s7547_s0, 3392, %s30_s25, [#allocation3]  }
  0x45   :  { %s7226_s30 = scalar_lea.vmem %s52_s7, 16  ;;  %s7230_s9 = scalar_lea.vmem %s52_s7, 32 }
  0x46   :  { %p7227_p2 = scmp.ne.s32.totalorder %s52_s7, %s7226_s30  ;;  %p7231_p3 = scmp.lt.s32.totalorder %s52_s7, %s52_s7 }
  0x47   :  { %p7232_p4 = scmp.lt.s32.totalorder %s7230_s9, %s7226_s30 }
  0x49   :  { %p7233_p5 = por %p7232_p4, %p7231_p3 }
  0x4b   :  { %p7234_p6 = pnand %p7233_p5, %p7227_p2 }
  0x4d   :  { %7237 = shalt.err (!%p7234_p6)
}
  0x4e   :  { %54 = dma.hbm_to_vmem [thread:$0]  %s7549_s2, 16, %s52_s7, [#allocation6]  }
  0x4f   :  { %s7361_s1 = smov [#allocation10]   ;;  %s7362_s13 = smov [#allocation13]  }
  0x50   :  { %s73_s12 = sshll.u32 %s7361_s1, 4  ;;  %s95_s14 = sshll.u32 %s7362_s13, 4  ;;  %s74_s12 = int_to_ptr.vmem [resolvable:$true] %s73_s12  ;;  %s96_s14 = int_to_ptr.vmem [resolvable:$true] %s95_s14 }
  0x51   :  { %s7246_s15 = scalar_lea.vmem %s74_s12, 16  ;;  %s7250_s0 = scalar_lea.vmem %s74_s12, 32 }
  0x52   :  { %p7247_p7 = scmp.ne.s32.totalorder %s74_s12, %s7246_s15  ;;  %p7251_p8 = scmp.lt.s32.totalorder %s74_s12, %s74_s12 }
  0x53   :  { %p7252_p9 = scmp.lt.s32.totalorder %s7250_s0, %s7246_s15 }
  0x55   :  { %p7253_p10 = por %p7252_p9, %p7251_p8 }
  0x57   :  { %p7254_p11 = pnand %p7253_p10, %p7247_p7 }
  0x59   :  { %7257 = shalt.err (!%p7254_p11)
}
  0x5a   :  { %76 = dma.hbm_to_vmem [thread:$0]  %s7551_s4, 16, %s74_s12, [#allocation9]  }
  0x5b   :  { %s7266_s17 = scalar_lea.vmem %s96_s14, 16  ;;  %s7270_s2 = scalar_lea.vmem %s96_s14, 32 }
  0x5c   :  { %p7267_p12 = scmp.ne.s32.totalorder %s96_s14, %s7266_s17  ;;  %p7271_p13 = scmp.lt.s32.totalorder %s96_s14, %s96_s14 }
  0x5d   :  { %p7272_p0 = scmp.lt.s32.totalorder %s7270_s2, %s7266_s17 }
  0x5f   :  { %p7273_p1 = por %p7272_p0, %p7271_p13 }
  0x61   :  { %p7274_p2 = pnand %p7273_p1, %p7267_p12 }
  0x63   :  { %7277 = shalt.err (!%p7274_p2)
}
  0x64   :  { %98 = dma.hbm_to_vmem [thread:$0]  %s7553_s6, 16, %s96_s14, [#allocation12]  }
  0x65   :  { %s7363_s5 = smov [#allocation16]   ;;  %s7364_s23 = smov [#allocation19]  }
  0x66   :  { %s117_s22 = sshll.u32 %s7363_s5, 4  ;;  %s139_s24 = sshll.u32 %s7364_s23, 4  ;;  %s118_s22 = int_to_ptr.vmem [resolvable:$true] %s117_s22  ;;  %s140_s24 = int_to_ptr.vmem [resolvable:$true] %s139_s24 }
  0x67   :  { %s7286_s25 = scalar_lea.vmem %s118_s22, 16  ;;  %s7290_s4 = scalar_lea.vmem %s118_s22, 32 }
  0x68   :  { %p7287_p3 = scmp.ne.s32.totalorder %s118_s22, %s7286_s25  ;;  %p7291_p4 = scmp.lt.s32.totalorder %s118_s22, %s118_s22 }
  0x69   :  { %p7292_p5 = scmp.lt.s32.totalorder %s7290_s4, %s7286_s25 }
  0x6b   :  { %p7293_p6 = por %p7292_p5, %p7291_p4 }
  0x6d   :  { %p7294_p7 = pnand %p7293_p6, %p7287_p3 }
  0x6f   :  { %7297 = shalt.err (!%p7294_p7)
}
  0x70   :  { %120 = dma.hbm_to_vmem [thread:$0]  %s7555_s8, 16, %s118_s22, [#allocation15]  }
  0x71   :  { %s7306_s27 = scalar_lea.vmem %s140_s24, 16  ;;  %s7310_s6 = scalar_lea.vmem %s140_s24, 32 }
  0x72   :  { %p7307_p8 = scmp.ne.s32.totalorder %s140_s24, %s7306_s27  ;;  %p7311_p9 = scmp.lt.s32.totalorder %s140_s24, %s140_s24 }
  0x73   :  { %p7312_p10 = scmp.lt.s32.totalorder %s7310_s6, %s7306_s27 }
  0x75   :  { %p7313_p11 = por %p7312_p10, %p7311_p9 }
  0x77   :  { %p7314_p12 = pnand %p7313_p11, %p7307_p8 }
  0x79   :  { %7317 = shalt.err (!%p7314_p12)
}
  0x7a   :  { %142 = dma.hbm_to_vmem [thread:$0]  %s7557_s10, 16, %s140_s24, [#allocation18]  }
  0x7b   :  { %7338 = dma.done.wait [#allocation3], 3392  }
  0x7c   :  { %7339 = vsyncadd [#allocation3], 4294963904 }
  0x7d   :  { %7340 = dma.done.wait [#allocation6], 54288  }
  0x7e   :  { %7341 = vsyncadd [#allocation6], 4294913008 }
  0x7f   :  { %7342 = dma.done.wait [#allocation9], 1040  }
  0x80   :  { %7343 = vsyncadd [#allocation9], 4294966256 }
  0x81   :  { %7344 = dma.done.wait [#allocation12], 1040  }
  0x82   :  { %7345 = vsyncadd [#allocation12], 4294966256 }
  0x83   :  { %7346 = dma.done.wait [#allocation15], 1040  }
  0x84   :  { %7347 = vsyncadd [#allocation15], 4294966256 }
  0x85   :  { %7348 = dma.done.wait [#allocation18], 1040  }
  0x86   :  { %7349 = vsyncadd [#allocation18], 4294966256  ;;  %v6589_v0 = vld [vmem:[#allocation5 + $0x78] sm:$0xff]   ;;  %v6593_v4 = vld [vmem:[#allocation5 + $0x70] sm:$0xff]   ;;  %vm7366_vm0 = vmmov 0   ;;  %s7367_s8 = smov [#allocation20]  }
  0x87   :  { %v6590_v1 = vld [vmem:[#allocation5 + $0x38] sm:$0xff]   ;;  %5856 = vmatprep.subr.bf16.mxu0 %v6589_v0  ;;  %v6594_v5 = vld [vmem:[#allocation5 + $0x30] sm:$0xff]   ;;  %v6597_v8 = vld [vmem:[#allocation5 + $0x68] sm:$0xff]   ;;  %s5328_s10 = sshll.u32 %s7367_s8, 4  ;;  %s5329_s10 = int_to_ptr.vmem [resolvable:$true] %s5328_s10 }
  0x88   :  { %v6591_v2 = vld [vmem:[#allocation5 + $0xf8] sm:$0xff]   ;;  %5857 = vmatpush3.bf16.msra.mxu0 %v6590_v1  ;;  %v6595_v6 = vld [vmem:[#allocation5 + $0xf0] sm:$0xff]   ;;  %v6598_v9 = vld [vmem:[#allocation5 + $0x28] sm:$0xff]   ;;  %s7318_s30 = scalar_lea.vmem %s5329_s10, 128  ;;  %p7323_p0 = scmp.lt.s32.totalorder %s5329_s10, %s5329_s10 }
  0x89   :  { %v6592_v3 = vld [vmem:[#allocation5 + $0xb8] sm:$0xff]   ;;  %5878 = vmatprep.subr.bf16.mxu1 %v6591_v2  ;;  %5858 = vmatprep.subr.bf16.mxu0 %v6593_v4  ;;  %v6596_v7 = vld [vmem:[#allocation5 + $0xb0] sm:$0xff]   ;;  %v6599_v10 = vld [vmem:[#allocation5 + $0xe8] sm:$0xff]   ;;  %p7319_p13 = scmp.ne.s32.totalorder %s5329_s10, %s7318_s30  ;;  %p7324_p1 = scmp.lt.s32.totalorder %s7318_s30, %s7318_s30 }
  0x8a   :  { %5879 = vmatpush3.bf16.msra.mxu1 %v6592_v3  ;;  %v6600_v11 = vld [vmem:[#allocation5 + $0xa8] sm:$0xff]   ;;  %v6601_v12 = vld [vmem:[#allocation5 + $0x60] sm:$0xff]   ;;  %v6605_v16 = vld [vmem:[#allocation5 + $0x58] sm:$0xff]  }
  0x8b   :  { %5880 = vmatprep.subr.bf16.mxu1 %v6595_v6  ;;  %v6602_v13 = vld [vmem:[#allocation5 + $0x20] sm:$0xff]   ;;  %v6606_v17 = vld [vmem:[#allocation5 + $0x18] sm:$0xff]   ;;  %v6609_v20 = vld [vmem:[#allocation5 + $0x50] sm:$0xff]   ;;  %p7325_p2 = por %p7324_p1, %p7323_p0 }
  0x8c   :  { %5859 = vmatpush3.bf16.msra.mxu0 %v6594_v5  ;;  %v6603_v14 = vld [vmem:[#allocation5 + $0xe0] sm:$0xff]   ;;  %v6607_v18 = vld [vmem:[#allocation5 + $0xd8] sm:$0xff]   ;;  %v6610_v21 = vld [vmem:[#allocation5 + $0x10] sm:$0xff]  }
  0x8d   :  { %5860 = vmatprep.subr.bf16.mxu0 %v6597_v8  ;;  %v6604_v15 = vld [vmem:[#allocation5 + $0xa0] sm:$0xff]   ;;  %v6608_v19 = vld [vmem:[#allocation5 + $0x98] sm:$0xff]   ;;  %v6611_v22 = vld [vmem:[#allocation5 + $0xd0] sm:$0xff]   ;;  %p7326_p3 = pnand %p7325_p2, %p7319_p13 }
  0x8e   :  { %5881 = vmatpush3.bf16.msra.mxu1 %v6596_v7  ;;  %v6612_v23 = vld [vmem:[#allocation5 + $0x90] sm:$0xff]   ;;  %v6613_v24 = vld [vmem:[#allocation5 + $0x48] sm:$0xff]   ;;  %v6617_v28 = vld [vmem:[#allocation5 + $0x40] sm:$0xff]  }
  0x8f   :  { %5882 = vmatprep.subr.bf16.mxu1 %v6599_v10  ;;  %v6614_v25 = vld [vmem:[#allocation5 + $0x8] sm:$0xff]   ;;  %v6618_v29 = vld [vmem:[#allocation5] sm:$0xff]   ;;  %v6623_v35 = vld [vmem:[#allocation5 + $0x178] sm:$0xff]  }
  0x90   :  { %5861 = vmatpush3.bf16.msra.mxu0 %v6598_v9  ;;  %v6615_v26 = vld [vmem:[#allocation5 + $0xc8] sm:$0xff]   ;;  %v6619_v30 = vld [vmem:[#allocation5 + $0xc0] sm:$0xff]   ;;  %v178_v36 = vld [vmem:[#allocation2 + $0x8] sm:$0xff] }
  0x91   :  { %5862 = vmatprep.subr.bf16.mxu0 %v6601_v12  ;;  %v6616_v27 = vld [vmem:[#allocation5 + $0x88] sm:$0xff]   ;;  %v6622_v34 = vld [vmem:[#allocation5 + $0x80] sm:$0xff]   ;;  %v5345_v37 = vcombine.low %v178_v36, %v178_v36  ;;  %v5346_v38 = vcombine.high %v178_v36, %v178_v36  ;;  %v6626_v39 = vld [vmem:[#allocation5 + $0x138] sm:$0xff]  }
  0x92   :  { %5883 = vmatpush3.bf16.msra.mxu1 %v6600_v11  ;;  %v177_v31 = vld [vmem:[#allocation2] sm:$0xff]  ;;  %v6627_v40 = vld [vmem:[#allocation5 + $0x1f8] sm:$0xff]   ;;  %v6637_v50 = vld [vmem:[#allocation5 + $0x160] sm:$0xff]  }
  0x93   :  { %5884 = vmatprep.subr.bf16.mxu1 %v6603_v14  ;;  %v5343_v32 = vcombine.low %v177_v31, %v177_v31  ;;  %v5344_v33 = vcombine.high %v177_v31, %v177_v31  ;;  %3861 = vmatprep.mubr.bf16.mxu1 %v5346_v38  ;;  %v6628_v41 = vld [vmem:[#allocation5 + $0x1b8] sm:$0xff]   ;;  %v6629_v42 = vld [vmem:[#allocation5 + $0x170] sm:$0xff]   ;;  %v6633_v46 = vld [vmem:[#allocation5 + $0x168] sm:$0xff]  }
  0x94   :  { %5863 = vmatpush3.bf16.msra.mxu0 %v6602_v13  ;;  %v6630_v43 = vld [vmem:[#allocation5 + $0x130] sm:$0xff]   ;;  %v6634_v47 = vld [vmem:[#allocation5 + $0x128] sm:$0xff]   ;;  %v6638_v51 = vld [vmem:[#allocation5 + $0x120] sm:$0xff]  }
  0x95   :  { %5864 = vmatprep.subr.bf16.mxu0 %v6605_v16  ;;  %3821 = vmatprep.mubr.bf16.mxu0 %v5344_v33  ;;  %v6631_v44 = vld [vmem:[#allocation5 + $0x1f0] sm:$0xff]   ;;  %v6635_v48 = vld [vmem:[#allocation5 + $0x1e8] sm:$0xff]   ;;  %v6639_v52 = vld [vmem:[#allocation5 + $0x1e0] sm:$0xff]  }
  0x96   :  { %5885 = vmatpush3.bf16.msra.mxu1 %v6604_v15  ;;  %v6632_v45 = vld [vmem:[#allocation5 + $0x1b0] sm:$0xff]   ;;  %v6636_v49 = vld [vmem:[#allocation5 + $0x1a8] sm:$0xff]   ;;  %v6640_v53 = vld [vmem:[#allocation5 + $0x1a0] sm:$0xff]  }
  0x97   :  { %5886 = vmatprep.subr.bf16.mxu1 %v6607_v18  ;;  %v6641_v54 = vld [vmem:[#allocation5 + $0x158] sm:$0xff]   ;;  %v6645_v58 = vld [vmem:[#allocation5 + $0x150] sm:$0xff]   ;;  %v6649_v62 = vld [vmem:[#allocation5 + $0x148] sm:$0xff]  }
  0x98   :  { %5865 = vmatpush3.bf16.msra.mxu0 %v6606_v17  ;;  %v6642_v55 = vld [vmem:[#allocation5 + $0x118] sm:$0xff]   ;;  %v6646_v59 = vld [vmem:[#allocation5 + $0x110] sm:$0xff]   ;;  %v6650_v63 = vld [vmem:[#allocation5 + $0x108] sm:$0xff]  }
  0x99   :  { %5866 = vmatprep.subr.bf16.mxu0 %v6609_v20  ;;  %v6643_v56 = vld [vmem:[#allocation5 + $0x1d8] sm:$0xff]   ;;  %v6647_v60 = vld [vmem:[#allocation5 + $0x1d0] sm:$0xff]   ;;  %v6651_v0 = vld [vmem:[#allocation5 + $0x1c8] sm:$0xff]  }
  0x9a   :  { %5887 = vmatpush3.bf16.msra.mxu1 %v6608_v19  ;;  %v6644_v57 = vld [vmem:[#allocation5 + $0x198] sm:$0xff]   ;;  %v6648_v61 = vld [vmem:[#allocation5 + $0x190] sm:$0xff]   ;;  %v6652_v1 = vld [vmem:[#allocation5 + $0x188] sm:$0xff]  }
  0x9b   :  { %5888 = vmatprep.subr.bf16.mxu1 %v6611_v22  ;;  %v6653_v2 = vld [vmem:[#allocation5 + $0x140] sm:$0xff]   ;;  %v6659_v9 = vld [vmem:[#allocation5 + $0x278] sm:$0xff]   ;;  %v6665_v16 = vld [vmem:[#allocation5 + $0x270] sm:$0xff]  }
  0x9c   :  { %5867 = vmatpush3.bf16.msra.mxu0 %v6610_v21  ;;  %v6654_v3 = vld [vmem:[#allocation5 + $0x100] sm:$0xff]   ;;  %v6662_v13 = vld [vmem:[#allocation5 + $0x238] sm:$0xff]   ;;  %v6666_v17 = vld [vmem:[#allocation5 + $0x230] sm:$0xff]  }
  0x9d   :  { %5868 = vmatprep.subr.bf16.mxu0 %v6613_v24  ;;  %v6655_v4 = vld [vmem:[#allocation5 + $0x1c0] sm:$0xff]   ;;  %v6663_v14 = vld [vmem:[#allocation5 + $0x2f8] sm:$0xff]   ;;  %v6667_v18 = vld [vmem:[#allocation5 + $0x2f0] sm:$0xff]  }
  0x9e   :  { %5889 = vmatpush3.bf16.msra.mxu1 %v6612_v23  ;;  %v179_v5 = vld [vmem:[#allocation2 + $0x10] sm:$0xff]  ;;  %v180_v10 = vld [vmem:[#allocation2 + $0x18] sm:$0xff]  ;;  %v6668_v19 = vld [vmem:[#allocation5 + $0x2b0] sm:$0xff]  }
  0x9f   :  { %5890 = vmatprep.subr.bf16.mxu1 %v6615_v26  ;;  %v5347_v6 = vcombine.low %v179_v5, %v179_v5  ;;  %v5348_v7 = vcombine.high %v179_v5, %v179_v5  ;;  %v6658_v8 = vld [vmem:[#allocation5 + $0x180] sm:$0xff]   ;;  %v5349_v11 = vcombine.low %v180_v10, %v180_v10  ;;  %v5350_v12 = vcombine.high %v180_v10, %v180_v10  ;;  %v6664_v15 = vld [vmem:[#allocation5 + $0x2b8] sm:$0xff]   ;;  %v6669_v20 = vld [vmem:[#allocation5 + $0x268] sm:$0xff]  }
  0xa0   :  { %5869 = vmatpush3.bf16.msra.mxu0 %v6614_v25  ;;  %v6670_v21 = vld [vmem:[#allocation5 + $0x228] sm:$0xff]   ;;  %v6673_v24 = vld [vmem:[#allocation5 + $0x260] sm:$0xff]   ;;  %v6680_v31 = vld [vmem:[#allocation5 + $0x298] sm:$0xff]  }
  0xa1   :  { %5870 = vmatprep.subr.bf16.mxu0 %v6617_v28  ;;  %v6671_v22 = vld [vmem:[#allocation5 + $0x2e8] sm:$0xff]   ;;  %v6674_v25 = vld [vmem:[#allocation5 + $0x220] sm:$0xff]   ;;  %v6677_v28 = vld [vmem:[#allocation5 + $0x258] sm:$0xff]  }
  0xa2   :  { %5891 = vmatpush3.bf16.msra.mxu1 %v6616_v27  ;;  %v6672_v23 = vld [vmem:[#allocation5 + $0x2a8] sm:$0xff]   ;;  %v6675_v26 = vld [vmem:[#allocation5 + $0x2e0] sm:$0xff]   ;;  %v6682_v33 = vld [vmem:[#allocation5 + $0x210] sm:$0xff]  }
  0xa3   :  { %5892 = vmatprep.subr.bf16.mxu1 %v6619_v30  ;;  %v6676_v27 = vld [vmem:[#allocation5 + $0x2a0] sm:$0xff]   ;;  %v6679_v30 = vld [vmem:[#allocation5 + $0x2d8] sm:$0xff]   ;;  %v6685_v36 = vld [vmem:[#allocation5 + $0x248] sm:$0xff]  }
  0xa4   :  { %5871 = vmatpush3.bf16.msra.mxu0 %v6618_v29  ;;  %v6678_v29 = vld [vmem:[#allocation5 + $0x218] sm:$0xff]   ;;  %v6687_v38 = vld [vmem:[#allocation5 + $0x2c8] sm:$0xff]  }
  0xa5   :  { %5900 = vmatprep.subr.bf16.mxu0 %v6623_v35  ;;  %v6684_v35 = vld [vmem:[#allocation5 + $0x290] sm:$0xff]   ;;  %v6716_v5 = vld [vmem:[#allocation5 + $0x398] sm:$0xff]   ;;  %v6721_v10 = vld [vmem:[#allocation5 + $0x348] sm:$0xff]  }
  0xa6   :  { %5893 = vmatpush3.bf16.msra.mxu1 %v6622_v34  ;;  %v6683_v34 = vld [vmem:[#allocation5 + $0x2d0] sm:$0xff]  }
  0xa7   :  { %3822 = vmatmul.mubr.bf16.vlgmr.msra.gmra.mxu0 %v5343_v32  ;;  %5922 = vmatprep.subr.bf16.mxu1 %v6627_v40  ;;  %v6681_v32 = vld [vmem:[#allocation5 + $0x250] sm:$0xff]   ;;  %v6689_v40 = vld [vmem:[#allocation5 + $0x240] sm:$0xff]  }
  0xa8   :  { %5901 = vmatpush3.bf16.msra.mxu0 %v6626_v39  ;;  %3901 = vmatprep.mubr.bf16.mxu0 %v5348_v7  ;;  %v6688_v39 = vld [vmem:[#allocation5 + $0x288] sm:$0xff]   ;;  %v6718_v7 = vld [vmem:[#allocation5 + $0x310] sm:$0xff]  }
  0xa9   :  { %3862 = vmatmul.mubr.bf16.vlgmr.msra.gmra.mxu1 %v5345_v37  ;;  %5902 = vmatprep.subr.bf16.mxu0 %v6629_v42  ;;  %v6686_v37 = vld [vmem:[#allocation5 + $0x208] sm:$0xff]   ;;  %v6691_v42 = vld [vmem:[#allocation5 + $0x2c0] sm:$0xff]  }
  0xaa   :  { %5923 = vmatpush3.bf16.msra.mxu1 %v6628_v41  ;;  %3941 = vmatprep.mubr.bf16.mxu1 %v5350_v12  ;;  %v6690_v41 = vld [vmem:[#allocation5 + $0x200] sm:$0xff]   ;;  %v6723_v12 = vld [vmem:[#allocation5 + $0x3c8] sm:$0xff]  }
  0xab   :  { %5924 = vmatprep.subr.bf16.mxu1 %v6631_v44 }
  0xac   :  { %5903 = vmatpush3.bf16.msra.mxu0 %v6630_v43  ;;  %v181_v43 = vld [vmem:[#allocation2 + $0x20] sm:$0xff] }
  0xad   :  { %5904 = vmatprep.subr.bf16.mxu0 %v6633_v46  ;;  %v5351_v44 = vcombine.low %v181_v43, %v181_v43  ;;  %v6694_v46 = vld [vmem:[#allocation5 + $0x280] sm:$0xff]  }
  0xae   :  { %5925 = vmatpush3.bf16.msra.mxu1 %v6632_v45  ;;  %v5352_v45 = vcombine.high %v181_v43, %v181_v43  ;;  %v6752_v43 = vld [vmem:[#allocation5 + $0x498] sm:$0xff]  }
  0xaf   :  { %5926 = vmatprep.subr.bf16.mxu1 %v6635_v48  ;;  %v182_v48 = vld [vmem:[#allocation2 + $0x28] sm:$0xff] }
  0xb0   :  { %5905 = vmatpush3.bf16.msra.mxu0 %v6634_v47  ;;  %v6695_v47 = vld [vmem:[#allocation5 + $0x378] sm:$0xff]  }
  0xb1   :  { %5906 = vmatprep.subr.bf16.mxu0 %v6637_v50  ;;  %v5354_v50 = vcombine.high %v182_v48, %v182_v48 }
  0xb2   :  { %5927 = vmatpush3.bf16.msra.mxu1 %v6636_v49  ;;  %v5353_v49 = vcombine.low %v182_v48, %v182_v48  ;;  %v6757_v48 = vld [vmem:[#allocation5 + $0x448] sm:$0xff]  }
  0xb3   :  { %5928 = vmatprep.subr.bf16.mxu1 %v6639_v52  ;;  %v6699_v52 = vld [vmem:[#allocation5 + $0x3f8] sm:$0xff]  }
  0xb4   :  { %5907 = vmatpush3.bf16.msra.mxu0 %v6638_v51  ;;  %v6698_v51 = vld [vmem:[#allocation5 + $0x338] sm:$0xff]  }
  0xb5   :  { %5908 = vmatprep.subr.bf16.mxu0 %v6641_v54  ;;  %v6701_v54 = vld [vmem:[#allocation5 + $0x370] sm:$0xff]  }
  0xb6   :  { %5929 = vmatpush3.bf16.msra.mxu1 %v6640_v53  ;;  %v6700_v53 = vld [vmem:[#allocation5 + $0x3b8] sm:$0xff]  }
  0xb7   :  { %5930 = vmatprep.subr.bf16.mxu1 %v6643_v56  ;;  %v6703_v56 = vld [vmem:[#allocation5 + $0x3f0] sm:$0xff]  }
  0xb8   :  { %5909 = vmatpush3.bf16.msra.mxu0 %v6642_v55  ;;  %v6702_v55 = vld [vmem:[#allocation5 + $0x330] sm:$0xff]  }
  0xb9   :  { %5910 = vmatprep.subr.bf16.mxu0 %v6645_v58  ;;  %v6705_v58 = vld [vmem:[#allocation5 + $0x368] sm:$0xff]  }
  0xba   :  { %5931 = vmatpush3.bf16.msra.mxu1 %v6644_v57  ;;  %v6704_v57 = vld [vmem:[#allocation5 + $0x3b0] sm:$0xff]  }
  0xbb   :  { %5932 = vmatprep.subr.bf16.mxu1 %v6647_v60  ;;  %v6707_v60 = vld [vmem:[#allocation5 + $0x3e8] sm:$0xff]  }
  0xbc   :  { %5911 = vmatpush3.bf16.msra.mxu0 %v6646_v59  ;;  %v6706_v59 = vld [vmem:[#allocation5 + $0x328] sm:$0xff]  }
  0xbd   :  { %5912 = vmatprep.subr.bf16.mxu0 %v6649_v62  ;;  %v6709_v62 = vld [vmem:[#allocation5 + $0x360] sm:$0xff]  }
  0xbe   :  { %5933 = vmatpush3.bf16.msra.mxu1 %v6648_v61  ;;  %v6708_v61 = vld [vmem:[#allocation5 + $0x3a8] sm:$0xff]  }
  0xbf   :  { %5934 = vmatprep.subr.bf16.mxu1 %v6651_v0  ;;  %v6711_v0 = vld [vmem:[#allocation5 + $0x3e0] sm:$0xff]  }
  0xc0   :  { %5913 = vmatpush3.bf16.msra.mxu0 %v6650_v63  ;;  %v6710_v63 = vld [vmem:[#allocation5 + $0x320] sm:$0xff]  }
  0xc1   :  { %5914 = vmatprep.subr.bf16.mxu0 %v6653_v2  ;;  %v6713_v2 = vld [vmem:[#allocation5 + $0x358] sm:$0xff]  }
  0xc2   :  { %5935 = vmatpush3.bf16.msra.mxu1 %v6652_v1  ;;  %v6712_v1 = vld [vmem:[#allocation5 + $0x3a0] sm:$0xff]  }
  0xc3   :  { %5936 = vmatprep.subr.bf16.mxu1 %v6655_v4  ;;  %v6715_v4 = vld [vmem:[#allocation5 + $0x3d8] sm:$0xff]  }
  0xc4   :  { %5915 = vmatpush3.bf16.msra.mxu0 %v6654_v3  ;;  %v6714_v3 = vld [vmem:[#allocation5 + $0x318] sm:$0xff]  }
  0xc5   :  { %5944 = vmatprep.subr.bf16.mxu0 %v6659_v9  ;;  %v6720_v9 = vld [vmem:[#allocation5 + $0x390] sm:$0xff]  }
  0xc6   :  { %5937 = vmatpush3.bf16.msra.mxu1 %v6658_v8  ;;  %v6719_v8 = vld [vmem:[#allocation5 + $0x3d0] sm:$0xff]  }
  0xc7   :  { %3902 = vmatmul.mubr.bf16.vlgmr.msra.gmra.mxu0 %v5347_v6  ;;  %5966 = vmatprep.subr.bf16.mxu1 %v6663_v14  ;;  %v6717_v6 = vld [vmem:[#allocation5 + $0x350] sm:$0xff]   ;;  %v6725_v14 = vld [vmem:[#allocation5 + $0x340] sm:$0xff]  }
  0xc8   :  { %5945 = vmatpush3.bf16.msra.mxu0 %v6662_v13  ;;  %3981 = vmatprep.mubr.bf16.mxu0 %v5352_v45  ;;  %v6724_v13 = vld [vmem:[#allocation5 + $0x388] sm:$0xff]   ;;  %v6754_v45 = vld [vmem:[#allocation5 + $0x410] sm:$0xff]  }
  0xc9   :  { %3942 = vmatmul.mubr.bf16.vlgmr.msra.gmra.mxu1 %v5349_v11  ;;  %5946 = vmatprep.subr.bf16.mxu0 %v6665_v16  ;;  %v6722_v11 = vld [vmem:[#allocation5 + $0x308] sm:$0xff]   ;;  %v6727_v16 = vld [vmem:[#allocation5 + $0x3c0] sm:$0xff]  }
  0xca   :  { %5967 = vmatpush3.bf16.msra.mxu1 %v6664_v15  ;;  %4021 = vmatprep.mubr.bf16.mxu1 %v5354_v50  ;;  %v6726_v15 = vld [vmem:[#allocation5 + $0x300] sm:$0xff]   ;;  %v6759_v50 = vld [vmem:[#allocation5 + $0x4c8] sm:$0xff]  }
  0xcb   :  { %5968 = vmatprep.subr.bf16.mxu1 %v6667_v18 }
  0xcc   :  { %5947 = vmatpush3.bf16.msra.mxu0 %v6666_v17  ;;  %v183_v17 = vld [vmem:[#allocation2 + $0x30] sm:$0xff] }
  0xcd   :  { %5948 = vmatprep.subr.bf16.mxu0 %v6669_v20  ;;  %v5355_v18 = vcombine.low %v183_v17, %v183_v17  ;;  %v6730_v20 = vld [vmem:[#allocation5 + $0x380] sm:$0xff]  }
  0xce   :  { %5969 = vmatpush3.bf16.msra.mxu1 %v6668_v19  ;;  %v5356_v19 = vcombine.high %v183_v17, %v183_v17  ;;  %v6788_v17 = vld [vmem:[#allocation5 + $0x598] sm:$0xff]  }
  0xcf   :  { %5970 = vmatprep.subr.bf16.mxu1 %v6671_v22  ;;  %v184_v22 = vld [vmem:[#allocation2 + $0x38] sm:$0xff] }
  0xd0   :  { %5949 = vmatpush3.bf16.msra.mxu0 %v6670_v21  ;;  %v6731_v21 = vld [vmem:[#allocation5 + $0x478] sm:$0xff]  }
  0xd1   :  { %5950 = vmatprep.subr.bf16.mxu0 %v6673_v24  ;;  %v5358_v24 = vcombine.high %v184_v22, %v184_v22 }
  0xd2   :  { %5971 = vmatpush3.bf16.msra.mxu1 %v6672_v23  ;;  %v5357_v23 = vcombine.low %v184_v22, %v184_v22  ;;  %v6793_v22 = vld [vmem:[#allocation5 + $0x548] sm:$0xff]  }
  0xd3   :  { %5972 = vmatprep.subr.bf16.mxu1 %v6675_v26  ;;  %v6735_v26 = vld [vmem:[#allocation5 + $0x4f8] sm:$0xff]  }
  0xd4   :  { %5951 = vmatpush3.bf16.msra.mxu0 %v6674_v25  ;;  %v6734_v25 = vld [vmem:[#allocation5 + $0x438] sm:$0xff]  }
  0xd5   :  { %5952 = vmatprep.subr.bf16.mxu0 %v6677_v28  ;;  %v6737_v28 = vld [vmem:[#allocation5 + $0x470] sm:$0xff]  }
  0xd6   :  { %5973 = vmatpush3.bf16.msra.mxu1 %v6676_v27  ;;  %v6736_v27 = vld [vmem:[#allocation5 + $0x4b8] sm:$0xff]  }
  0xd7   :  { %5974 = vmatprep.subr.bf16.mxu1 %v6679_v30  ;;  %v6739_v30 = vld [vmem:[#allocation5 + $0x4f0] sm:$0xff]  }
  0xd8   :  { %5953 = vmatpush3.bf16.msra.mxu0 %v6678_v29  ;;  %v6738_v29 = vld [vmem:[#allocation5 + $0x430] sm:$0xff]  }
  0xd9   :  { %5954 = vmatprep.subr.bf16.mxu0 %v6681_v32  ;;  %v6741_v32 = vld [vmem:[#allocation5 + $0x468] sm:$0xff]  }
  0xda   :  { %5975 = vmatpush3.bf16.msra.mxu1 %v6680_v31  ;;  %v6740_v31 = vld [vmem:[#allocation5 + $0x4b0] sm:$0xff]  }
  0xdb   :  { %5976 = vmatprep.subr.bf16.mxu1 %v6683_v34  ;;  %v6743_v34 = vld [vmem:[#allocation5 + $0x4e8] sm:$0xff]  }
  0xdc   :  { %5955 = vmatpush3.bf16.msra.mxu0 %v6682_v33  ;;  %v6742_v33 = vld [vmem:[#allocation5 + $0x428] sm:$0xff]  }
  0xdd   :  { %5956 = vmatprep.subr.bf16.mxu0 %v6685_v36  ;;  %v6745_v36 = vld [vmem:[#allocation5 + $0x460] sm:$0xff]  }
  0xde   :  { %5977 = vmatpush3.bf16.msra.mxu1 %v6684_v35  ;;  %v6744_v35 = vld [vmem:[#allocation5 + $0x4a8] sm:$0xff]  }
  0xdf   :  { %5978 = vmatprep.subr.bf16.mxu1 %v6687_v38  ;;  %v6747_v38 = vld [vmem:[#allocation5 + $0x4e0] sm:$0xff]  }
  0xe0   :  { %5957 = vmatpush3.bf16.msra.mxu0 %v6686_v37  ;;  %v6746_v37 = vld [vmem:[#allocation5 + $0x420] sm:$0xff]  }
  0xe1   :  { %5958 = vmatprep.subr.bf16.mxu0 %v6689_v40  ;;  %v6749_v40 = vld [vmem:[#allocation5 + $0x458] sm:$0xff]  }
  0xe2   :  { %5979 = vmatpush3.bf16.msra.mxu1 %v6688_v39  ;;  %v6748_v39 = vld [vmem:[#allocation5 + $0x4a0] sm:$0xff]  }
  0xe3   :  { %5980 = vmatprep.subr.bf16.mxu1 %v6691_v42  ;;  %v6751_v42 = vld [vmem:[#allocation5 + $0x4d8] sm:$0xff]  }
  0xe4   :  { %5959 = vmatpush3.bf16.msra.mxu0 %v6690_v41  ;;  %v6750_v41 = vld [vmem:[#allocation5 + $0x418] sm:$0xff]  }
  0xe5   :  { %5988 = vmatprep.subr.bf16.mxu0 %v6695_v47  ;;  %v6756_v47 = vld [vmem:[#allocation5 + $0x490] sm:$0xff]  }
  0xe6   :  { %5981 = vmatpush3.bf16.msra.mxu1 %v6694_v46  ;;  %v6755_v46 = vld [vmem:[#allocation5 + $0x4d0] sm:$0xff]  }
  0xe7   :  { %3982 = vmatmul.mubr.bf16.vlgmr.msra.gmra.mxu0 %v5351_v44  ;;  %6010 = vmatprep.subr.bf16.mxu1 %v6699_v52  ;;  %v6753_v44 = vld [vmem:[#allocation5 + $0x450] sm:$0xff]   ;;  %v6761_v52 = vld [vmem:[#allocation5 + $0x440] sm:$0xff]  }
  0xe8   :  { %5989 = vmatpush3.bf16.msra.mxu0 %v6698_v51  ;;  %4061 = vmatprep.mubr.bf16.mxu0 %v5356_v19  ;;  %v6760_v51 = vld [vmem:[#allocation5 + $0x488] sm:$0xff]   ;;  %v6790_v19 = vld [vmem:[#allocation5 + $0x510] sm:$0xff]  }
  0xe9   :  { %4022 = vmatmul.mubr.bf16.vlgmr.msra.gmra.mxu1 %v5353_v49  ;;  %5990 = vmatprep.subr.bf16.mxu0 %v6701_v54  ;;  %v6758_v49 = vld [vmem:[#allocation5 + $0x408] sm:$0xff]   ;;  %v6763_v54 = vld [vmem:[#allocation5 + $0x4c0] sm:$0xff]  }
  0xea   :  { %6011 = vmatpush3.bf16.msra.mxu1 %v6700_v53  ;;  %4101 = vmatprep.mubr.bf16.mxu1 %v5358_v24  ;;  %v6762_v53 = vld [vmem:[#allocation5 + $0x400] sm:$0xff]   ;;  %v6795_v24 = vld [vmem:[#allocation5 + $0x5c8] sm:$0xff]  }
  0xeb   :  { %6012 = vmatprep.subr.bf16.mxu1 %v6703_v56 }
  0xec   :  { %5991 = vmatpush3.bf16.msra.mxu0 %v6702_v55  ;;  %v185_v55 = vld [vmem:[#allocation2 + $0x40] sm:$0xff] }
  0xed   :  { %5992 = vmatprep.subr.bf16.mxu0 %v6705_v58  ;;  %v5359_v56 = vcombine.low %v185_v55, %v185_v55  ;;  %v6766_v58 = vld [vmem:[#allocation5 + $0x480] sm:$0xff]  }
  0xee   :  { %6013 = vmatpush3.bf16.msra.mxu1 %v6704_v57  ;;  %v5360_v57 = vcombine.high %v185_v55, %v185_v55  ;;  %v6824_v55 = vld [vmem:[#allocation5 + $0x698] sm:$0xff]  }
  0xef   :  { %6014 = vmatprep.subr.bf16.mxu1 %v6707_v60  ;;  %v186_v60 = vld [vmem:[#allocation2 + $0x48] sm:$0xff] }
  0xf0   :  { %5993 = vmatpush3.bf16.msra.mxu0 %v6706_v59  ;;  %v6767_v59 = vld [vmem:[#allocation5 + $0x578] sm:$0xff]  }
  0xf1   :  { %5994 = vmatprep.subr.bf16.mxu0 %v6709_v62  ;;  %v5362_v62 = vcombine.high %v186_v60, %v186_v60 }
  0xf2   :  { %6015 = vmatpush3.bf16.msra.mxu1 %v6708_v61  ;;  %v5361_v61 = vcombine.low %v186_v60, %v186_v60  ;;  %v6829_v60 = vld [vmem:[#allocation5 + $0x648] sm:$0xff]  }
  0xf3   :  { %6016 = vmatprep.subr.bf16.mxu1 %v6711_v0  ;;  %v6771_v0 = vld [vmem:[#allocation5 + $0x5f8] sm:$0xff]  }
  0xf4   :  { %5995 = vmatpush3.bf16.msra.mxu0 %v6710_v63  ;;  %v6770_v63 = vld [vmem:[#allocation5 + $0x538] sm:$0xff]  }
  0xf5   :  { %5996 = vmatprep.subr.bf16.mxu0 %v6713_v2  ;;  %v6773_v2 = vld [vmem:[#allocation5 + $0x570] sm:$0xff]  }
  0xf6   :  { %6017 = vmatpush3.bf16.msra.mxu1 %v6712_v1  ;;  %v6772_v1 = vld [vmem:[#allocation5 + $0x5b8] sm:$0xff]  }
  0xf7   :  { %6018 = vmatprep.subr.bf16.mxu1 %v6715_v4  ;;  %v6775_v4 = vld [vmem:[#allocation5 + $0x5f0] sm:$0xff]  }
  0xf8   :  { %5997 = vmatpush3.bf16.msra.mxu0 %v6714_v3  ;;  %v6774_v3 = vld [vmem:[#allocation5 + $0x530] sm:$0xff]  }
  0xf9   :  { %5998 = vmatprep.subr.bf16.mxu0 %v6717_v6  ;;  %v6777_v6 = vld [vmem:[#allocation5 + $0x568] sm:$0xff]  }
  0xfa   :  { %6019 = vmatpush3.bf16.msra.mxu1 %v6716_v5  ;;  %v6776_v5 = vld [vmem:[#allocation5 + $0x5b0] sm:$0xff]  }
  0xfb   :  { %6020 = vmatprep.subr.bf16.mxu1 %v6719_v8  ;;  %v6779_v8 = vld [vmem:[#allocation5 + $0x5e8] sm:$0xff]  }
  0xfc   :  { %5999 = vmatpush3.bf16.msra.mxu0 %v6718_v7  ;;  %v6778_v7 = vld [vmem:[#allocation5 + $0x528] sm:$0xff]  }
  0xfd   :  { %6000 = vmatprep.subr.bf16.mxu0 %v6721_v10  ;;  %v6781_v10 = vld [vmem:[#allocation5 + $0x560] sm:$0xff]  }
  0xfe   :  { %6021 = vmatpush3.bf16.msra.mxu1 %v6720_v9  ;;  %v6780_v9 = vld [vmem:[#allocation5 + $0x5a8] sm:$0xff]  }
  0xff   :  { %6022 = vmatprep.subr.bf16.mxu1 %v6723_v12  ;;  %v6783_v12 = vld [vmem:[#allocation5 + $0x5e0] sm:$0xff]  }
 0x100   :  { %6001 = vmatpush3.bf16.msra.mxu0 %v6722_v11  ;;  %v6782_v11 = vld [vmem:[#allocation5 + $0x520] sm:$0xff]  }
 0x101   :  { %6002 = vmatprep.subr.bf16.mxu0 %v6725_v14  ;;  %v6785_v14 = vld [vmem:[#allocation5 + $0x558] sm:$0xff]  }
 0x102   :  { %6023 = vmatpush3.bf16.msra.mxu1 %v6724_v13  ;;  %v6784_v13 = vld [vmem:[#allocation5 + $0x5a0] sm:$0xff]  }
 0x103   :  { %6024 = vmatprep.subr.bf16.mxu1 %v6727_v16  ;;  %v6787_v16 = vld [vmem:[#allocation5 + $0x5d8] sm:$0xff]  }
 0x104   :  { %6003 = vmatpush3.bf16.msra.mxu0 %v6726_v15  ;;  %v6786_v15 = vld [vmem:[#allocation5 + $0x518] sm:$0xff]  }
 0x105   :  { %6032 = vmatprep.subr.bf16.mxu0 %v6731_v21  ;;  %v6792_v21 = vld [vmem:[#allocation5 + $0x590] sm:$0xff]  }
 0x106   :  { %6025 = vmatpush3.bf16.msra.mxu1 %v6730_v20  ;;  %v6791_v20 = vld [vmem:[#allocation5 + $0x5d0] sm:$0xff]  }
 0x107   :  { %4062 = vmatmul.mubr.bf16.vlgmr.msra.gmra.mxu0 %v5355_v18  ;;  %6054 = vmatprep.subr.bf16.mxu1 %v6735_v26  ;;  %v6789_v18 = vld [vmem:[#allocation5 + $0x550] sm:$0xff]   ;;  %v6797_v26 = vld [vmem:[#allocation5 + $0x540] sm:$0xff]  }
 0x108   :  { %6033 = vmatpush3.bf16.msra.mxu0 %v6734_v25  ;;  %4141 = vmatprep.mubr.bf16.mxu0 %v5360_v57  ;;  %v6796_v25 = vld [vmem:[#allocation5 + $0x588] sm:$0xff]   ;;  %v6826_v57 = vld [vmem:[#allocation5 + $0x610] sm:$0xff]  }
 0x109   :  { %4102 = vmatmul.mubr.bf16.vlgmr.msra.gmra.mxu1 %v5357_v23  ;;  %6034 = vmatprep.subr.bf16.mxu0 %v6737_v28  ;;  %v6794_v23 = vld [vmem:[#allocation5 + $0x508] sm:$0xff]   ;;  %v6799_v28 = vld [vmem:[#allocation5 + $0x5c0] sm:$0xff]  }
 0x10a   :  { %6055 = vmatpush3.bf16.msra.mxu1 %v6736_v27  ;;  %4181 = vmatprep.mubr.bf16.mxu1 %v5362_v62  ;;  %v6798_v27 = vld [vmem:[#allocation5 + $0x500] sm:$0xff]   ;;  %v6831_v62 = vld [vmem:[#allocation5 + $0x6c8] sm:$0xff]  }
 0x10b   :  { %6056 = vmatprep.subr.bf16.mxu1 %v6739_v30 }
 0x10c   :  { %6035 = vmatpush3.bf16.msra.mxu0 %v6738_v29  ;;  %v187_v29 = vld [vmem:[#allocation2 + $0x50] sm:$0xff] }
 0x10d   :  { %6036 = vmatprep.subr.bf16.mxu0 %v6741_v32  ;;  %v5363_v30 = vcombine.low %v187_v29, %v187_v29  ;;  %v6802_v32 = vld [vmem:[#allocation5 + $0x580] sm:$0xff]  }
 0x10e   :  { %6057 = vmatpush3.bf16.msra.mxu1 %v6740_v31  ;;  %v5364_v31 = vcombine.high %v187_v29, %v187_v29 }
 0x10f   :  { %6058 = vmatprep.subr.bf16.mxu1 %v6743_v34  ;;  %v188_v34 = vld [vmem:[#allocation2 + $0x58] sm:$0xff] }
 0x110   :  { %6037 = vmatpush3.bf16.msra.mxu0 %v6742_v33  ;;  %v6803_v33 = vld [vmem:[#allocation5 + $0x678] sm:$0xff]  }
 0x111   :  { %6038 = vmatprep.subr.bf16.mxu0 %v6745_v36  ;;  %v5366_v36 = vcombine.high %v188_v34, %v188_v34 }
 0x112   :  { %6059 = vmatpush3.bf16.msra.mxu1 %v6744_v35  ;;  %v5365_v35 = vcombine.low %v188_v34, %v188_v34  ;;  %v6852_v34 = vld [vmem:[#allocation5 + $0x7a8] sm:$0xff]  }
 0x113   :  { %6060 = vmatprep.subr.bf16.mxu1 %v6747_v38  ;;  %v6807_v38 = vld [vmem:[#allocation5 + $0x6f8] sm:$0xff]  }
 0x114   :  { %6039 = vmatpush3.bf16.msra.mxu0 %v6746_v37  ;;  %v6806_v37 = vld [vmem:[#allocation5 + $0x638] sm:$0xff]  }
 0x115   :  { %6040 = vmatprep.subr.bf16.mxu0 %v6749_v40  ;;  %v6809_v40 = vld [vmem:[#allocation5 + $0x670] sm:$0xff]  }
 0x116   :  { %6061 = vmatpush3.bf16.msra.mxu1 %v6748_v39  ;;  %v6808_v39 = vld [vmem:[#allocation5 + $0x6b8] sm:$0xff]  }
 0x117   :  { %6062 = vmatprep.subr.bf16.mxu1 %v6751_v42  ;;  %v6811_v42 = vld [vmem:[#allocation5 + $0x6f0] sm:$0xff]  }
 0x118   :  { %6041 = vmatpush3.bf16.msra.mxu0 %v6750_v41  ;;  %v6810_v41 = vld [vmem:[#allocation5 + $0x630] sm:$0xff]  }
 0x119   :  { %6042 = vmatprep.subr.bf16.mxu0 %v6753_v44  ;;  %v6813_v44 = vld [vmem:[#allocation5 + $0x668] sm:$0xff]  }
 0x11a   :  { %6063 = vmatpush3.bf16.msra.mxu1 %v6752_v43  ;;  %v6812_v43 = vld [vmem:[#allocation5 + $0x6b0] sm:$0xff]  }
 0x11b   :  { %6064 = vmatprep.subr.bf16.mxu1 %v6755_v46  ;;  %v6815_v46 = vld [vmem:[#allocation5 + $0x6e8] sm:$0xff]  }
 0x11c   :  { %6043 = vmatpush3.bf16.msra.mxu0 %v6754_v45  ;;  %v6814_v45 = vld [vmem:[#allocation5 + $0x628] sm:$0xff]  }
 0x11d   :  { %6044 = vmatprep.subr.bf16.mxu0 %v6757_v48  ;;  %v6817_v48 = vld [vmem:[#allocation5 + $0x660] sm:$0xff]  }
 0x11e   :  { %6065 = vmatpush3.bf16.msra.mxu1 %v6756_v47  ;;  %v6816_v47 = vld [vmem:[#allocation5 + $0x6a8] sm:$0xff]  }
 0x11f   :  { %6066 = vmatprep.subr.bf16.mxu1 %v6759_v50  ;;  %v6819_v50 = vld [vmem:[#allocation5 + $0x6e0] sm:$0xff]  }
 0x120   :  { %6045 = vmatpush3.bf16.msra.mxu0 %v6758_v49  ;;  %v6818_v49 = vld [vmem:[#allocation5 + $0x620] sm:$0xff]  }
 0x121   :  { %6046 = vmatprep.subr.bf16.mxu0 %v6761_v52  ;;  %v6821_v52 = vld [vmem:[#allocation5 + $0x658] sm:$0xff]  }
 0x122   :  { %6067 = vmatpush3.bf16.msra.mxu1 %v6760_v51  ;;  %v6820_v51 = vld [vmem:[#allocation5 + $0x6a0] sm:$0xff]  }
 0x123   :  { %6068 = vmatprep.subr.bf16.mxu1 %v6763_v54  ;;  %v6823_v54 = vld [vmem:[#allocation5 + $0x6d8] sm:$0xff]  }
 0x124   :  { %6047 = vmatpush3.bf16.msra.mxu0 %v6762_v53  ;;  %v6822_v53 = vld [vmem:[#allocation5 + $0x618] sm:$0xff]  }
 0x125   :  { %6076 = vmatprep.subr.bf16.mxu0 %v6767_v59  ;;  %v6828_v59 = vld [vmem:[#allocation5 + $0x690] sm:$0xff]  }
 0x126   :  { %6069 = vmatpush3.bf16.msra.mxu1 %v6766_v58  ;;  %v6827_v58 = vld [vmem:[#allocation5 + $0x6d0] sm:$0xff]  }
 0x127   :  { %4142 = vmatmul.mubr.bf16.vlgmr.msra.gmra.mxu0 %v5359_v56  ;;  %6098 = vmatprep.subr.bf16.mxu1 %v6771_v0  ;;  %v6825_v56 = vld [vmem:[#allocation5 + $0x650] sm:$0xff]   ;;  %v6833_v0 = vld [vmem:[#allocation5 + $0x640] sm:$0xff]  }
 0x128   :  { %6077 = vmatpush3.bf16.msra.mxu0 %v6770_v63  ;;  %4221 = vmatprep.mubr.bf16.mxu0 %v5364_v31  ;;  %v6832_v63 = vld [vmem:[#allocation5 + $0x688] sm:$0xff]  }
 0x129   :  { %4182 = vmatmul.mubr.bf16.vlgmr.msra.gmra.mxu1 %v5361_v61  ;;  %6078 = vmatprep.subr.bf16.mxu0 %v6773_v2  ;;  %v6830_v61 = vld [vmem:[#allocation5 + $0x608] sm:$0xff]   ;;  %v6835_v2 = vld [vmem:[#allocation5 + $0x6c0] sm:$0xff]  }
 0x12a   :  { %6099 = vmatpush3.bf16.msra.mxu1 %v6772_v1  ;;  %4261 = vmatprep.mubr.bf16.mxu1 %v5366_v36  ;;  %v6834_v1 = vld [vmem:[#allocation5 + $0x600] sm:$0xff]   ;;  %v6849_v31 = vld [vmem:[#allocation5 + $0x768] sm:$0xff]  }
 0x12b   :  { %6100 = vmatprep.subr.bf16.mxu1 %v6775_v4  ;;  %v6854_v36 = vld [vmem:[#allocation5 + $0x720] sm:$0xff]  }
 0x12c   :  { %6079 = vmatpush3.bf16.msra.mxu0 %v6774_v3  ;;  %v189_v3 = vld [vmem:[#allocation2 + $0x60] sm:$0xff] }
 0x12d   :  { %6080 = vmatprep.subr.bf16.mxu0 %v6777_v6  ;;  %v5368_v6 = vcombine.high %v189_v3, %v189_v3 }
 0x12e   :  { %6101 = vmatpush3.bf16.msra.mxu1 %v6776_v5  ;;  %v5367_v5 = vcombine.low %v189_v3, %v189_v3 }
 0x12f   :  { %6102 = vmatprep.subr.bf16.mxu1 %v6779_v8  ;;  %v6839_v8 = vld [vmem:[#allocation5 + $0x778] sm:$0xff]  }
 0x130   :  { %6081 = vmatpush3.bf16.msra.mxu0 %v6778_v7  ;;  %v6838_v7 = vld [vmem:[#allocation5 + $0x680] sm:$0xff]  }
 0x131   :  { %6082 = vmatprep.subr.bf16.mxu0 %v6781_v10 }
 0x132   :  { %6103 = vmatpush3.bf16.msra.mxu1 %v6780_v9  ;;  %v190_v9 = vld [vmem:[#allocation2 + $0x68] sm:$0xff] }
 0x133   :  { %6104 = vmatprep.subr.bf16.mxu1 %v6783_v12  ;;  %v5369_v12 = vcombine.low %v190_v9, %v190_v9 }
 0x134   :  { %6083 = vmatpush3.bf16.msra.mxu0 %v6782_v11 }
 0x135   :  { %6084 = vmatprep.subr.bf16.mxu0 %v6785_v14  ;;  %v6842_v14 = vld [vmem:[#allocation5 + $0x738] sm:$0xff]  }
 0x136   :  { %6105 = vmatpush3.bf16.msra.mxu1 %v6784_v13  ;;  %v5370_v13 = vcombine.high %v190_v9, %v190_v9 }
 0x137   :  { %6106 = vmatprep.subr.bf16.mxu1 %v6787_v16 }
 0x138   :  { %6085 = vmatpush3.bf16.msra.mxu0 %v6786_v15  ;;  %v5342_v15 = vld [vmem:[#allocation7] ss:$0 sm:$0xff] }
 0x139   :  { %6086 = vmatprep.subr.bf16.mxu0 %v6789_v18 }
 0x13a   :  { %6107 = vmatpush3.bf16.msra.mxu1 %v6788_v17  ;;  %v6843_v17 = vld [vmem:[#allocation5 + $0x7f8] sm:$0xff]  }
 0x13b   :  { %6108 = vmatprep.subr.bf16.mxu1 %v6791_v20 }
 0x13c   :  { %6087 = vmatpush3.bf16.msra.mxu0 %v6790_v19 }
 0x13d   :  { %6088 = vmatprep.subr.bf16.mxu0 %v6793_v22 }
 0x13e   :  { %6109 = vmatpush3.bf16.msra.mxu1 %v6792_v21  ;;  %v6844_v21 = vld [vmem:[#allocation5 + $0x7b8] sm:$0xff]  }
 0x13f   :  { %6110 = vmatprep.subr.bf16.mxu1 %v6795_v24 }
 0x140   :  { %6089 = vmatpush3.bf16.msra.mxu0 %v6794_v23  ;;  %v6845_v23 = vld [vmem:[#allocation5 + $0x770] sm:$0xff]  }
 0x141   :  { %6090 = vmatprep.subr.bf16.mxu0 %v6797_v26 }
 0x142   :  { %6111 = vmatpush3.bf16.msra.mxu1 %v6796_v25 }
 0x143   :  { %6112 = vmatprep.subr.bf16.mxu1 %v6799_v28  ;;  %v6847_v28 = vld [vmem:[#allocation5 + $0x7f0] sm:$0xff]  }
 0x144   :  { %6091 = vmatpush3.bf16.msra.mxu0 %v6798_v27  ;;  %v6846_v27 = vld [vmem:[#allocation5 + $0x730] sm:$0xff]  }
 0x145   :  { %6120 = vmatprep.subr.bf16.mxu0 %v6803_v33  ;;  %v6851_v33 = vld [vmem:[#allocation5 + $0x7e8] sm:$0xff]  }
 0x146   :  { %6113 = vmatpush3.bf16.msra.mxu1 %v6802_v32  ;;  %v6850_v32 = vld [vmem:[#allocation5 + $0x728] sm:$0xff]  }
 0x147   :  { %4222 = vmatmul.mubr.bf16.vlgmr.msra.gmra.mxu0 %v5363_v30  ;;  %6142 = vmatprep.subr.bf16.mxu1 %v6807_v38  ;;  %v6848_v30 = vld [vmem:[#allocation5 + $0x7b0] sm:$0xff]   ;;  %v6856_v38 = vld [vmem:[#allocation5 + $0x7a0] sm:$0xff]  }
 0x148   :  { %6121 = vmatpush3.bf16.msra.mxu0 %v6806_v37  ;;  %4301 = vmatprep.mubr.bf16.mxu0 %v5368_v6  ;;  %v6855_v37 = vld [vmem:[#allocation5 + $0x7e0] sm:$0xff]  }
 0x149   :  { %4262 = vmatmul.mubr.bf16.vlgmr.msra.gmra.mxu1 %v5365_v35  ;;  %6122 = vmatprep.subr.bf16.mxu0 %v6809_v40  ;;  %v6853_v35 = vld [vmem:[#allocation5 + $0x760] sm:$0xff]   ;;  %v6858_v40 = vld [vmem:[#allocation5 + $0x718] sm:$0xff]  }
 0x14a   :  { %6143 = vmatpush3.bf16.msra.mxu1 %v6808_v39  ;;  %4341 = vmatprep.mubr.bf16.mxu1 %v5370_v13  ;;  %v6857_v39 = vld [vmem:[#allocation5 + $0x758] sm:$0xff]   ;;  %v6882_v13 = vld [vmem:[#allocation5 + $0x830] sm:$0xff]  }
 0x14b   :  { %6144 = vmatprep.subr.bf16.mxu1 %v6811_v42  ;;  %v6860_v42 = vld [vmem:[#allocation5 + $0x798] sm:$0xff]  }
 0x14c   :  { %6123 = vmatpush3.bf16.msra.mxu0 %v6810_v41  ;;  %v6859_v41 = vld [vmem:[#allocation5 + $0x7d8] sm:$0xff]  }
 0x14d   :  { %6124 = vmatprep.subr.bf16.mxu0 %v6813_v44  ;;  %v6862_v44 = vld [vmem:[#allocation5 + $0x710] sm:$0xff]  }
 0x14e   :  { %6145 = vmatpush3.bf16.msra.mxu1 %v6812_v43  ;;  %v6861_v43 = vld [vmem:[#allocation5 + $0x750] sm:$0xff]  }
 0x14f   :  { %6146 = vmatprep.subr.bf16.mxu1 %v6815_v46  ;;  %v6864_v46 = vld [vmem:[#allocation5 + $0x790] sm:$0xff]  }
 0x150   :  { %6125 = vmatpush3.bf16.msra.mxu0 %v6814_v45  ;;  %v6863_v45 = vld [vmem:[#allocation5 + $0x7d0] sm:$0xff]  }
 0x151   :  { %6126 = vmatprep.subr.bf16.mxu0 %v6817_v48  ;;  %v6866_v48 = vld [vmem:[#allocation5 + $0x708] sm:$0xff]  }
 0x152   :  { %6147 = vmatpush3.bf16.msra.mxu1 %v6816_v47  ;;  %v6865_v47 = vld [vmem:[#allocation5 + $0x748] sm:$0xff]  }
 0x153   :  { %6148 = vmatprep.subr.bf16.mxu1 %v6819_v50  ;;  %v6868_v50 = vld [vmem:[#allocation5 + $0x788] sm:$0xff]  }
 0x154   :  { %6127 = vmatpush3.bf16.msra.mxu0 %v6818_v49  ;;  %v6867_v49 = vld [vmem:[#allocation5 + $0x7c8] sm:$0xff]  }
 0x155   :  { %6128 = vmatprep.subr.bf16.mxu0 %v6821_v52  ;;  %v6870_v52 = vld [vmem:[#allocation5 + $0x700] sm:$0xff]  }
 0x156   :  { %6149 = vmatpush3.bf16.msra.mxu1 %v6820_v51  ;;  %v6869_v51 = vld [vmem:[#allocation5 + $0x740] sm:$0xff]  }
 0x157   :  { %6150 = vmatprep.subr.bf16.mxu1 %v6823_v54 }
 0x158   :  { %6129 = vmatpush3.bf16.msra.mxu0 %v6822_v53  ;;  %v6871_v53 = vld [vmem:[#allocation5 + $0x7c0] sm:$0xff]  }
 0x159   :  { %6130 = vmatprep.subr.bf16.mxu0 %v6825_v56 }
 0x15a   :  { %6151 = vmatpush3.bf16.msra.mxu1 %v6824_v55  ;;  %v191_v55 = vld [vmem:[#allocation2 + $0x70] sm:$0xff] }
 0x15b   :  { %6152 = vmatprep.subr.bf16.mxu1 %v6827_v58  ;;  %v5371_v56 = vcombine.low %v191_v55, %v191_v55  ;;  %v6874_v58 = vld [vmem:[#allocation5 + $0x780] sm:$0xff]  }
 0x15c   :  { %6131 = vmatpush3.bf16.msra.mxu0 %v6826_v57  ;;  %v5372_v57 = vcombine.high %v191_v55, %v191_v55 }
 0x15d   :  { %6132 = vmatprep.subr.bf16.mxu0 %v6829_v60  ;;  %v6875_v60 = vld [vmem:[#allocation5 + $0x878] sm:$0xff]  }
 0x15e   :  { %6153 = vmatpush3.bf16.msra.mxu1 %v6828_v59 }
 0x15f   :  { %6154 = vmatprep.subr.bf16.mxu1 %v6831_v62 }
 0x160   :  { %6133 = vmatpush3.bf16.msra.mxu0 %v6830_v61  ;;  %v192_v61 = vld [vmem:[#allocation2 + $0x78] sm:$0xff] }
 0x161   :  { %6134 = vmatprep.subr.bf16.mxu0 %v6833_v0  ;;  %v5373_v0 = vcombine.low %v192_v61, %v192_v61 }
 0x162   :  { %6155 = vmatpush3.bf16.msra.mxu1 %v6832_v63 }
 0x163   :  { %6156 = vmatprep.subr.bf16.mxu1 %v6835_v2  ;;  %v6878_v2 = vld [vmem:[#allocation5 + $0x838] sm:$0xff]  }
 0x164   :  { %6135 = vmatpush3.bf16.msra.mxu0 %v6834_v1  ;;  %v5374_v1 = vcombine.high %v192_v61, %v192_v61 }
 0x165   :  { %6164 = vmatprep.subr.bf16.mxu0 %v6839_v8 }
 0x166   :  { %6157 = vmatpush3.bf16.msra.mxu1 %v6838_v7  ;;  %v6880_v7 = vld [vmem:[#allocation5 + $0x8b8] sm:$0xff]  }
 0x167   :  { %v5872_v4 = vpop.f32.mrf.mxu0  ;;  %4302 = vmatmul.mubr.bf16.vlgmr.msra.gmra.mxu0 %v5367_v5  ;;  %6186 = vmatprep.subr.bf16.mxu1 %v6843_v17  ;;  %v6879_v5 = vld [vmem:[#allocation5 + $0x8f8] sm:$0xff]   ;;  %v6885_v17 = vld [vmem:[#allocation5 + $0x868] sm:$0xff]  }
 0x168   :  { %6165 = vmatpush3.bf16.msra.mxu0 %v6842_v14  ;;  %4381 = vmatprep.mubr.bf16.mxu0 %v5372_v57  ;;  %v6883_v14 = vld [vmem:[#allocation5 + $0x8f0] sm:$0xff]  }
 0x169   :  { %v5873_v10 = vpop.f32.mrf.mxu0  ;;  %v5894_v11 = vpop.f32.mrf.mxu1  ;;  %4342 = vmatmul.mubr.bf16.vlgmr.msra.gmra.mxu1 %v5369_v12  ;;  %6166 = vmatprep.subr.bf16.mxu0 %v6845_v23  ;;  %v6891_v23 = vld [vmem:[#allocation5 + $0x8e0] sm:$0xff]  }
 0x16a   :  { %v5874_v16 = vadd.f32 %v5873_v10, %v5872_v4  ;;  %6187 = vmatpush3.bf16.msra.mxu1 %v6844_v21  ;;  %4421 = vmatprep.mubr.bf16.mxu1 %v5374_v1  ;;  %v6881_v10 = vld [vmem:[#allocation5 + $0x870] sm:$0xff]   ;;  %v6889_v21 = vld [vmem:[#allocation5 + $0x860] sm:$0xff]  }
 0x16b   :  { %v5875_v18 = vpop.f32.mrf.mxu0  ;;  %v5895_v19 = vpop.f32.mrf.mxu1  ;;  %6188 = vmatprep.subr.bf16.mxu1 %v6847_v28  ;;  %v6896_v28 = vld [vmem:[#allocation5 + $0x898] sm:$0xff]   ;;  %v6919_v1 = vld [vmem:[#allocation5 + $0x9f0] sm:$0xff]  }
 0x16c   :  { %v3824_v20 = vadd.f32 %v5874_v16, %v5342_v15  ;;  %v5896_v22 = vadd.f32 %v5895_v19, %v5894_v11  ;;  %6167 = vmatpush3.bf16.msra.mxu0 %v6846_v27  ;;  %v6884_v16 = vld [vmem:[#allocation5 + $0x8b0] sm:$0xff]   ;;  %v6886_v18 = vld [vmem:[#allocation5 + $0x828] sm:$0xff]   ;;  %v6895_v27 = vld [vmem:[#allocation5 + $0x8d8] sm:$0xff]  }
 0x16d   :  { %v5876_v24 = vpop.f32.mrf.mxu0  ;;  %v5897_v25 = vpop.f32.mrf.mxu1  ;;  %6168 = vmatprep.subr.bf16.mxu0 %v6849_v31  ;;  %v6887_v19 = vld [vmem:[#allocation5 + $0x8e8] sm:$0xff]   ;;  %v6899_v31 = vld [vmem:[#allocation5 + $0x8d0] sm:$0xff]  }
 0x16e   :  { %v7476_v26 = vadd.f32 %v5896_v22, %v3824_v20  ;;  %6189 = vmatpush3.bf16.msra.mxu1 %v6848_v30  ;;  %v6888_v20 = vld [vmem:[#allocation5 + $0x8a8] sm:$0xff]   ;;  %v6890_v22 = vld [vmem:[#allocation5 + $0x820] sm:$0xff]   ;;  %v6893_v25 = vld [vmem:[#allocation5 + $0x858] sm:$0xff]  }
 0x16f   :  { %v5898_v29 = vpop.f32.mrf.mxu1  ;;  %6190 = vmatprep.subr.bf16.mxu1 %v6851_v33  ;;  %v6892_v24 = vld [vmem:[#allocation5 + $0x8a0] sm:$0xff]   ;;  %v6898_v30 = vld [vmem:[#allocation5 + $0x810] sm:$0xff]   ;;  %v6901_v33 = vld [vmem:[#allocation5 + $0x848] sm:$0xff]  }
 0x170   :  { %6169 = vmatpush3.bf16.msra.mxu0 %v6850_v32  ;;  %v6897_v29 = vld [vmem:[#allocation5 + $0x850] sm:$0xff]  }
 0x171   :  { %6170 = vmatprep.subr.bf16.mxu0 %v6853_v35  ;;  %v6900_v32 = vld [vmem:[#allocation5 + $0x890] sm:$0xff]   ;;  %v6903_v35 = vld [vmem:[#allocation5 + $0x8c8] sm:$0xff]  }
 0x172   :  { %6191 = vmatpush3.bf16.msra.mxu1 %v6852_v34  ;;  %v6902_v34 = vld [vmem:[#allocation5 + $0x808] sm:$0xff]  }
 0x173   :  { %6192 = vmatprep.subr.bf16.mxu1 %v6855_v37  ;;  %v6905_v37 = vld [vmem:[#allocation5 + $0x840] sm:$0xff]  }
 0x174   :  { %6171 = vmatpush3.bf16.msra.mxu0 %v6854_v36  ;;  %v6904_v36 = vld [vmem:[#allocation5 + $0x888] sm:$0xff]  }
 0x175   :  { %6172 = vmatprep.subr.bf16.mxu0 %v6857_v39  ;;  %v6907_v39 = vld [vmem:[#allocation5 + $0x8c0] sm:$0xff]  }
 0x176   :  { %6193 = vmatpush3.bf16.msra.mxu1 %v6856_v38  ;;  %v6906_v38 = vld [vmem:[#allocation5 + $0x800] sm:$0xff]  }
 0x177   :  { %6194 = vmatprep.subr.bf16.mxu1 %v6859_v41 }
 0x178   :  { %6173 = vmatpush3.bf16.msra.mxu0 %v6858_v40  ;;  %v193_v40 = vld [vmem:[#allocation2 + $0x80] sm:$0xff] }
 0x179   :  { %6174 = vmatprep.subr.bf16.mxu0 %v6861_v43  ;;  %v5376_v43 = vcombine.high %v193_v40, %v193_v40 }
 0x17a   :  { %6195 = vmatpush3.bf16.msra.mxu1 %v6860_v42  ;;  %v5375_v42 = vcombine.low %v193_v40, %v193_v40 }
 0x17b   :  { %6196 = vmatprep.subr.bf16.mxu1 %v6863_v45  ;;  %v6911_v45 = vld [vmem:[#allocation5 + $0x978] sm:$0xff]  }
 0x17c   :  { %6175 = vmatpush3.bf16.msra.mxu0 %v6862_v44  ;;  %v6910_v44 = vld [vmem:[#allocation5 + $0x880] sm:$0xff]  }
 0x17d   :  { %6176 = vmatprep.subr.bf16.mxu0 %v6865_v47 }
 0x17e   :  { %6197 = vmatpush3.bf16.msra.mxu1 %v6864_v46 }
 0x17f   :  { %6198 = vmatprep.subr.bf16.mxu1 %v6867_v49 }
 0x180   :  { %6177 = vmatpush3.bf16.msra.mxu0 %v6866_v48  ;;  %v194_v48 = vld [vmem:[#allocation2 + $0x88] sm:$0xff] }
 0x181   :  { %6178 = vmatprep.subr.bf16.mxu0 %v6869_v51  ;;  %v5378_v51 = vcombine.high %v194_v48, %v194_v48 }
 0x182   :  { %6199 = vmatpush3.bf16.msra.mxu1 %v6868_v50  ;;  %v5377_v50 = vcombine.low %v194_v48, %v194_v48 }
 0x183   :  { %6200 = vmatprep.subr.bf16.mxu1 %v6871_v53 }
 0x184   :  { %6179 = vmatpush3.bf16.msra.mxu0 %v6870_v52  ;;  %v6914_v52 = vld [vmem:[#allocation5 + $0x938] sm:$0xff]  }
 0x185   :  { %6208 = vmatprep.subr.bf16.mxu0 %v6875_v60 }
 0x186   :  { %6201 = vmatpush3.bf16.msra.mxu1 %v6874_v58  ;;  %v6916_v58 = vld [vmem:[#allocation5 + $0x9b8] sm:$0xff]  }
 0x187   :  { %v5916_v54 = vpop.f32.mrf.mxu0  ;;  %4382 = vmatmul.mubr.bf16.vlgmr.msra.gmra.mxu0 %v5371_v56  ;;  %6230 = vmatprep.subr.bf16.mxu1 %v6879_v5  ;;  %v6915_v56 = vld [vmem:[#allocation5 + $0x9f8] sm:$0xff]   ;;  %v6923_v5 = vld [vmem:[#allocation5 + $0x9e8] sm:$0xff]  }
 0x188   :  { %6209 = vmatpush3.bf16.msra.mxu0 %v6878_v2  ;;  %4461 = vmatprep.mubr.bf16.mxu0 %v5376_v43  ;;  %v6920_v2 = vld [vmem:[#allocation5 + $0x9b0] sm:$0xff]   ;;  %v6952_v43 = vld [vmem:[#allocation5 + $0xab8] sm:$0xff]  }
 0x189   :  { %v5917_v59 = vpop.f32.mrf.mxu0  ;;  %v5938_v63 = vpop.f32.mrf.mxu1  ;;  %4422 = vmatmul.mubr.bf16.vlgmr.msra.gmra.mxu1 %v5373_v0  ;;  %6210 = vmatprep.subr.bf16.mxu0 %v6881_v10  ;;  %v6928_v10 = vld [vmem:[#allocation5 + $0x9a0] sm:$0xff]  }
 0x18a   :  { %v5918_v62 = vadd.f32 %v5917_v59, %v5916_v54  ;;  %6231 = vmatpush3.bf16.msra.mxu1 %v6880_v7  ;;  %4501 = vmatprep.mubr.bf16.mxu1 %v5378_v51  ;;  %v6925_v7 = vld [vmem:[#allocation5 + $0x960] sm:$0xff]  }
 0x18b   :  { %v5919_v3 = vpop.f32.mrf.mxu0  ;;  %v5939_v6 = vpop.f32.mrf.mxu1  ;;  %6232 = vmatprep.subr.bf16.mxu1 %v6883_v14  ;;  %v6932_v14 = vld [vmem:[#allocation5 + $0x998] sm:$0xff]  }
 0x18c   :  { %v3904_v4 = vadd.f32 %v5918_v62, %v7476_v26  ;;  %v5940_v8 = vadd.f32 %v5939_v6, %v5938_v63  ;;  %6211 = vmatpush3.bf16.msra.mxu0 %v6882_v13  ;;  %v6894_v26 = vld [vmem:[#allocation5 + $0x818] sm:$0xff]   ;;  %v6917_v62 = vld [vmem:[#allocation5 + $0x970] sm:$0xff]   ;;  %v6921_v3 = vld [vmem:[#allocation5 + $0x968] sm:$0xff]  }
 0x18d   :  { %v5920_v9 = vpop.f32.mrf.mxu0  ;;  %v5941_v11 = vpop.f32.mrf.mxu1  ;;  %6212 = vmatprep.subr.bf16.mxu0 %v6885_v17  ;;  %v6918_v63 = vld [vmem:[#allocation5 + $0x930] sm:$0xff]   ;;  %v6924_v6 = vld [vmem:[#allocation5 + $0x9a8] sm:$0xff]   ;;  %v6931_v13 = vld [vmem:[#allocation5 + $0x9d8] sm:$0xff]  }
 0x18e   :  { %v7479_v12 = vadd.f32 %v5940_v8, %v3904_v4  ;;  %6233 = vmatpush3.bf16.msra.mxu1 %v6884_v16  ;;  %v6922_v4 = vld [vmem:[#allocation5 + $0x928] sm:$0xff]   ;;  %v6926_v8 = vld [vmem:[#allocation5 + $0x920] sm:$0xff]   ;;  %v6929_v11 = vld [vmem:[#allocation5 + $0x958] sm:$0xff]  }
 0x18f   :  { %v5942_v15 = vpop.f32.mrf.mxu1  ;;  %6234 = vmatprep.subr.bf16.mxu1 %v6887_v19  ;;  %v6927_v9 = vld [vmem:[#allocation5 + $0x9e0] sm:$0xff]   ;;  %v6934_v16 = vld [vmem:[#allocation5 + $0x910] sm:$0xff]   ;;  %v6937_v19 = vld [vmem:[#allocation5 + $0x948] sm:$0xff]  }
 0x190   :  { %6213 = vmatpush3.bf16.msra.mxu0 %v6886_v18  ;;  %v6933_v15 = vld [vmem:[#allocation5 + $0x950] sm:$0xff]  }
 0x191   :  { %6214 = vmatprep.subr.bf16.mxu0 %v6889_v21  ;;  %v6935_v17 = vld [vmem:[#allocation5 + $0x9d0] sm:$0xff]   ;;  %v6939_v21 = vld [vmem:[#allocation5 + $0x9c8] sm:$0xff]  }
 0x192   :  { %6235 = vmatpush3.bf16.msra.mxu1 %v6888_v20  ;;  %v6936_v18 = vld [vmem:[#allocation5 + $0x990] sm:$0xff]   ;;  %v6938_v20 = vld [vmem:[#allocation5 + $0x908] sm:$0xff]  }
 0x193   :  { %6236 = vmatprep.subr.bf16.mxu1 %v6891_v23  ;;  %v6941_v23 = vld [vmem:[#allocation5 + $0x940] sm:$0xff]  }
 0x194   :  { %6215 = vmatpush3.bf16.msra.mxu0 %v6890_v22  ;;  %v6940_v22 = vld [vmem:[#allocation5 + $0x988] sm:$0xff]  }
 0x195   :  { %6216 = vmatprep.subr.bf16.mxu0 %v6893_v25  ;;  %v6943_v25 = vld [vmem:[#allocation5 + $0x9c0] sm:$0xff]  }
 0x196   :  { %6237 = vmatpush3.bf16.msra.mxu1 %v6892_v24  ;;  %v6942_v24 = vld [vmem:[#allocation5 + $0x900] sm:$0xff]  }
 0x197   :  { %6238 = vmatprep.subr.bf16.mxu1 %v6895_v27 }
 0x198   :  { %6217 = vmatpush3.bf16.msra.mxu0 %v6894_v26  ;;  %v195_v26 = vld [vmem:[#allocation2 + $0x90] sm:$0xff] }
 0x199   :  { %6218 = vmatprep.subr.bf16.mxu0 %v6897_v29  ;;  %v5380_v29 = vcombine.high %v195_v26, %v195_v26 }
 0x19a   :  { %6239 = vmatpush3.bf16.msra.mxu1 %v6896_v28  ;;  %v5379_v28 = vcombine.low %v195_v26, %v195_v26 }
 0x19b   :  { %6240 = vmatprep.subr.bf16.mxu1 %v6899_v31  ;;  %v6947_v31 = vld [vmem:[#allocation5 + $0xa78] sm:$0xff]  }
 0x19c   :  { %6219 = vmatpush3.bf16.msra.mxu0 %v6898_v30  ;;  %v6946_v30 = vld [vmem:[#allocation5 + $0x980] sm:$0xff]  }
 0x19d   :  { %6220 = vmatprep.subr.bf16.mxu0 %v6901_v33 }
 0x19e   :  { %6241 = vmatpush3.bf16.msra.mxu1 %v6900_v32  ;;  %v196_v32 = vld [vmem:[#allocation2 + $0x98] sm:$0xff] }
 0x19f   :  { %6242 = vmatprep.subr.bf16.mxu1 %v6903_v35  ;;  %v5381_v35 = vcombine.low %v196_v32, %v196_v32 }
 0x1a0   :  { %6221 = vmatpush3.bf16.msra.mxu0 %v6902_v34 }
 0x1a1   :  { %6222 = vmatprep.subr.bf16.mxu0 %v6905_v37  ;;  %v6950_v37 = vld [vmem:[#allocation5 + $0xa38] sm:$0xff]  }
 0x1a2   :  { %6243 = vmatpush3.bf16.msra.mxu1 %v6904_v36  ;;  %v5382_v36 = vcombine.high %v196_v32, %v196_v32  ;;  %v6989_v32 = vld [vmem:[#allocation5 + $0xb70] sm:$0xff]  }
 0x1a3   :  { %6244 = vmatprep.subr.bf16.mxu1 %v6907_v39  ;;  %v6951_v39 = vld [vmem:[#allocation5 + $0xaf8] sm:$0xff]  }
 0x1a4   :  { %6223 = vmatpush3.bf16.msra.mxu0 %v6906_v38 }
 0x1a5   :  { %6252 = vmatprep.subr.bf16.mxu0 %v6911_v45  ;;  %v6953_v45 = vld [vmem:[#allocation5 + $0xa70] sm:$0xff]  }
 0x1a6   :  { %6245 = vmatpush3.bf16.msra.mxu1 %v6910_v44 }
 0x1a7   :  { %v5960_v41 = vpop.f32.mrf.mxu0  ;;  %4462 = vmatmul.mubr.bf16.vlgmr.msra.gmra.mxu0 %v5375_v42  ;;  %6274 = vmatprep.subr.bf16.mxu1 %v6915_v56  ;;  %v6960_v56 = vld [vmem:[#allocation5 + $0xaa8] sm:$0xff]  }
 0x1a8   :  { %6253 = vmatpush3.bf16.msra.mxu0 %v6914_v52  ;;  %4541 = vmatprep.mubr.bf16.mxu0 %v5380_v29  ;;  %v6956_v52 = vld [vmem:[#allocation5 + $0xab0] sm:$0xff]   ;;  %v6988_v29 = vld [vmem:[#allocation5 + $0xbb8] sm:$0xff]  }
 0x1a9   :  { %v5961_v46 = vpop.f32.mrf.mxu0  ;;  %v5982_v47 = vpop.f32.mrf.mxu1  ;;  %4502 = vmatmul.mubr.bf16.vlgmr.msra.gmra.mxu1 %v5377_v50  ;;  %6254 = vmatprep.subr.bf16.mxu0 %v6917_v62  ;;  %v6955_v50 = vld [vmem:[#allocation5 + $0xaf0] sm:$0xff]   ;;  %v6966_v62 = vld [vmem:[#allocation5 + $0xa18] sm:$0xff]  }
 0x1aa   :  { %v5962_v49 = vadd.f32 %v5961_v46, %v5960_v41  ;;  %6275 = vmatpush3.bf16.msra.mxu1 %v6916_v58  ;;  %4581 = vmatprep.mubr.bf16.mxu1 %v5382_v36  ;;  %v6962_v58 = vld [vmem:[#allocation5 + $0xa20] sm:$0xff]   ;;  %v6991_v36 = vld [vmem:[#allocation5 + $0xbf0] sm:$0xff]  }
 0x1ab   :  { %v5963_v53 = vpop.f32.mrf.mxu0  ;;  %v5983_v54 = vpop.f32.mrf.mxu1  ;;  %6276 = vmatprep.subr.bf16.mxu1 %v6919_v1  ;;  %v6969_v1 = vld [vmem:[#allocation5 + $0xa50] sm:$0xff]  }
 0x1ac   :  { %v3984_v55 = vadd.f32 %v5962_v49, %v7479_v12  ;;  %v5984_v57 = vadd.f32 %v5983_v54, %v5982_v47  ;;  %6255 = vmatpush3.bf16.msra.mxu0 %v6918_v63  ;;  %v6930_v12 = vld [vmem:[#allocation5 + $0x918] sm:$0xff]   ;;  %v6954_v49 = vld [vmem:[#allocation5 + $0xa30] sm:$0xff]   ;;  %v6957_v53 = vld [vmem:[#allocation5 + $0xa68] sm:$0xff]  }
 0x1ad   :  { %v5964_v59 = vpop.f32.mrf.mxu0  ;;  %v5985_v60 = vpop.f32.mrf.mxu1  ;;  %6256 = vmatprep.subr.bf16.mxu0 %v6921_v3  ;;  %v6958_v54 = vld [vmem:[#allocation5 + $0xa28] sm:$0xff]   ;;  %v6967_v63 = vld [vmem:[#allocation5 + $0xad8] sm:$0xff]   ;;  %v6971_v3 = vld [vmem:[#allocation5 + $0xad0] sm:$0xff]  }
 0x1ae   :  { %v7482_v61 = vadd.f32 %v5984_v57, %v3984_v55  ;;  %6277 = vmatpush3.bf16.msra.mxu1 %v6920_v2  ;;  %v6959_v55 = vld [vmem:[#allocation5 + $0xae8] sm:$0xff]   ;;  %v6961_v57 = vld [vmem:[#allocation5 + $0xa60] sm:$0xff]   ;;  %v6970_v2 = vld [vmem:[#allocation5 + $0xa10] sm:$0xff]  }
 0x1af   :  { %v5986_v0 = vpop.f32.mrf.mxu1  ;;  %6278 = vmatprep.subr.bf16.mxu1 %v6923_v5  ;;  %v6963_v59 = vld [vmem:[#allocation5 + $0xae0] sm:$0xff]   ;;  %v6973_v5 = vld [vmem:[#allocation5 + $0xa48] sm:$0xff]  }
 0x1b0   :  { %6257 = vmatpush3.bf16.msra.mxu0 %v6922_v4  ;;  %v6964_v60 = vld [vmem:[#allocation5 + $0xaa0] sm:$0xff]   ;;  %v6968_v0 = vld [vmem:[#allocation5 + $0xa98] sm:$0xff]   ;;  %v6972_v4 = vld [vmem:[#allocation5 + $0xa90] sm:$0xff]  }
 0x1b1   :  { %6258 = vmatprep.subr.bf16.mxu0 %v6925_v7  ;;  %v6975_v7 = vld [vmem:[#allocation5 + $0xac8] sm:$0xff]  }
 0x1b2   :  { %6279 = vmatpush3.bf16.msra.mxu1 %v6924_v6  ;;  %v6974_v6 = vld [vmem:[#allocation5 + $0xa08] sm:$0xff]  }
 0x1b3   :  { %6280 = vmatprep.subr.bf16.mxu1 %v6927_v9  ;;  %v6977_v9 = vld [vmem:[#allocation5 + $0xa40] sm:$0xff]  }
 0x1b4   :  { %6259 = vmatpush3.bf16.msra.mxu0 %v6926_v8  ;;  %v6976_v8 = vld [vmem:[#allocation5 + $0xa88] sm:$0xff]  }
 0x1b5   :  { %6260 = vmatprep.subr.bf16.mxu0 %v6929_v11  ;;  %v6979_v11 = vld [vmem:[#allocation5 + $0xac0] sm:$0xff]  }
 0x1b6   :  { %6281 = vmatpush3.bf16.msra.mxu1 %v6928_v10  ;;  %v6978_v10 = vld [vmem:[#allocation5 + $0xa00] sm:$0xff]  }
 0x1b7   :  { %6282 = vmatprep.subr.bf16.mxu1 %v6931_v13  ;;  %v197_v13 = vld [vmem:[#allocation2 + $0xa0] sm:$0xff] }
 0x1b8   :  { %6261 = vmatpush3.bf16.msra.mxu0 %v6930_v12 }
 0x1b9   :  { %6262 = vmatprep.subr.bf16.mxu0 %v6933_v15  ;;  %v5384_v15 = vcombine.high %v197_v13, %v197_v13 }
 0x1ba   :  { %6283 = vmatpush3.bf16.msra.mxu1 %v6932_v14  ;;  %v5383_v14 = vcombine.low %v197_v13, %v197_v13 }
 0x1bb   :  { %6284 = vmatprep.subr.bf16.mxu1 %v6935_v17 }
 0x1bc   :  { %6263 = vmatpush3.bf16.msra.mxu0 %v6934_v16  ;;  %v6982_v16 = vld [vmem:[#allocation5 + $0xa80] sm:$0xff]  }
 0x1bd   :  { %6264 = vmatprep.subr.bf16.mxu0 %v6937_v19  ;;  %v198_v19 = vld [vmem:[#allocation2 + $0xa8] sm:$0xff] }
 0x1be   :  { %6285 = vmatpush3.bf16.msra.mxu1 %v6936_v18  ;;  %v6983_v18 = vld [vmem:[#allocation5 + $0xb78] sm:$0xff]  }
 0x1bf   :  { %6286 = vmatprep.subr.bf16.mxu1 %v6939_v21 }
 0x1c0   :  { %6265 = vmatpush3.bf16.msra.mxu0 %v6938_v20 }
 0x1c1   :  { %6266 = vmatprep.subr.bf16.mxu0 %v6941_v23  ;;  %v5386_v23 = vcombine.high %v198_v19, %v198_v19 }
 0x1c2   :  { %6287 = vmatpush3.bf16.msra.mxu1 %v6940_v22  ;;  %v5385_v22 = vcombine.low %v198_v19, %v198_v19 }
 0x1c3   :  { %6288 = vmatprep.subr.bf16.mxu1 %v6943_v25 }
 0x1c4   :  { %6267 = vmatpush3.bf16.msra.mxu0 %v6942_v24  ;;  %v6986_v24 = vld [vmem:[#allocation5 + $0xb38] sm:$0xff]  }
 0x1c5   :  { %6296 = vmatprep.subr.bf16.mxu0 %v6947_v31 }
 0x1c6   :  { %6289 = vmatpush3.bf16.msra.mxu1 %v6946_v30 }
 0x1c7   :  { %v6004_v27 = vpop.f32.mrf.mxu0  ;;  %4542 = vmatmul.mubr.bf16.vlgmr.msra.gmra.mxu0 %v5379_v28  ;;  %6318 = vmatprep.subr.bf16.mxu1 %v6951_v39  ;;  %v6993_v39 = vld [vmem:[#allocation5 + $0xb68] sm:$0xff]  }
 0x1c8   :  { %6297 = vmatpush3.bf16.msra.mxu0 %v6950_v37  ;;  %4621 = vmatprep.mubr.bf16.mxu0 %v5384_v15 }
 0x1c9   :  { %v6005_v33 = vpop.f32.mrf.mxu0  ;;  %v6026_v34 = vpop.f32.mrf.mxu1  ;;  %4582 = vmatmul.mubr.bf16.vlgmr.msra.gmra.mxu1 %v5381_v35  ;;  %6298 = vmatprep.subr.bf16.mxu0 %v6953_v45  ;;  %v6990_v35 = vld [vmem:[#allocation5 + $0xb30] sm:$0xff]   ;;  %v6999_v45 = vld [vmem:[#allocation5 + $0xbe0] sm:$0xff]  }
 0x1ca   :  { %v6006_v38 = vadd.f32 %v6005_v33, %v6004_v27  ;;  %6319 = vmatpush3.bf16.msra.mxu1 %v6952_v43  ;;  %v6987_v27 = vld [vmem:[#allocation5 + $0xbf8] sm:$0xff]   ;;  %4661 = vmatprep.mubr.bf16.mxu1 %v5386_v23  ;;  %v6997_v43 = vld [vmem:[#allocation5 + $0xb60] sm:$0xff]   ;;  %v7027_v23 = vld [vmem:[#allocation5 + $0xcf0] sm:$0xff]  }
 0x1cb   :  { %v6007_v40 = vpop.f32.mrf.mxu0  ;;  %v6027_v41 = vpop.f32.mrf.mxu1  ;;  %6320 = vmatprep.subr.bf16.mxu1 %v6955_v50  ;;  %v7004_v50 = vld [vmem:[#allocation5 + $0xb98] sm:$0xff]  }
 0x1cc   :  { %v4064_v42 = vadd.f32 %v6006_v38, %v7482_v61  ;;  %v6028_v44 = vadd.f32 %v6027_v41, %v6026_v34  ;;  %6299 = vmatpush3.bf16.msra.mxu0 %v6954_v49  ;;  %v6965_v61 = vld [vmem:[#allocation5 + $0xa58] sm:$0xff]   ;;  %v6992_v38 = vld [vmem:[#allocation5 + $0xbb0] sm:$0xff]   ;;  %v6994_v40 = vld [vmem:[#allocation5 + $0xb28] sm:$0xff]  }
 0x1cd   :  { %v6008_v46 = vpop.f32.mrf.mxu0  ;;  %v6029_v47 = vpop.f32.mrf.mxu1  ;;  %6300 = vmatprep.subr.bf16.mxu0 %v6957_v53  ;;  %v6995_v41 = vld [vmem:[#allocation5 + $0xbe8] sm:$0xff]   ;;  %v7003_v49 = vld [vmem:[#allocation5 + $0xbd8] sm:$0xff]   ;;  %v7007_v53 = vld [vmem:[#allocation5 + $0xbd0] sm:$0xff]  }
 0x1ce   :  { %v7485_v48 = vadd.f32 %v6028_v44, %v4064_v42  ;;  %6321 = vmatpush3.bf16.msra.mxu1 %v6956_v52  ;;  %v6996_v42 = vld [vmem:[#allocation5 + $0xba8] sm:$0xff]   ;;  %v6998_v44 = vld [vmem:[#allocation5 + $0xb20] sm:$0xff]   ;;  %v7001_v47 = vld [vmem:[#allocation5 + $0xb58] sm:$0xff]  }
 0x1cf   :  { %v6030_v51 = vpop.f32.mrf.mxu1  ;;  %6322 = vmatprep.subr.bf16.mxu1 %v6959_v55  ;;  %v7000_v46 = vld [vmem:[#allocation5 + $0xba0] sm:$0xff]   ;;  %v7006_v52 = vld [vmem:[#allocation5 + $0xb10] sm:$0xff]   ;;  %v7009_v55 = vld [vmem:[#allocation5 + $0xb48] sm:$0xff]  }
 0x1d0   :  { %6301 = vmatpush3.bf16.msra.mxu0 %v6958_v54  ;;  %v7005_v51 = vld [vmem:[#allocation5 + $0xb50] sm:$0xff]  }
 0x1d1   :  { %6302 = vmatprep.subr.bf16.mxu0 %v6961_v57  ;;  %v7008_v54 = vld [vmem:[#allocation5 + $0xb90] sm:$0xff]   ;;  %v7011_v57 = vld [vmem:[#allocation5 + $0xbc8] sm:$0xff]  }
 0x1d2   :  { %6323 = vmatpush3.bf16.msra.mxu1 %v6960_v56  ;;  %v7010_v56 = vld [vmem:[#allocation5 + $0xb08] sm:$0xff]  }
 0x1d3   :  { %6324 = vmatprep.subr.bf16.mxu1 %v6963_v59  ;;  %v7013_v59 = vld [vmem:[#allocation5 + $0xb40] sm:$0xff]  }
 0x1d4   :  { %6303 = vmatpush3.bf16.msra.mxu0 %v6962_v58  ;;  %v7012_v58 = vld [vmem:[#allocation5 + $0xb88] sm:$0xff]  }
 0x1d5   :  { %6304 = vmatprep.subr.bf16.mxu0 %v6965_v61  ;;  %v7015_v61 = vld [vmem:[#allocation5 + $0xbc0] sm:$0xff]  }
 0x1d6   :  { %6325 = vmatpush3.bf16.msra.mxu1 %v6964_v60  ;;  %v7014_v60 = vld [vmem:[#allocation5 + $0xb00] sm:$0xff]  }
 0x1d7   :  { %6326 = vmatprep.subr.bf16.mxu1 %v6967_v63 }
 0x1d8   :  { %6305 = vmatpush3.bf16.msra.mxu0 %v6966_v62  ;;  %v199_v62 = vld [vmem:[#allocation2 + $0xb0] sm:$0xff] }
 0x1d9   :  { %6306 = vmatprep.subr.bf16.mxu0 %v6969_v1  ;;  %v5388_v1 = vcombine.high %v199_v62, %v199_v62 }
 0x1da   :  { %6327 = vmatpush3.bf16.msra.mxu1 %v6968_v0  ;;  %v5387_v0 = vcombine.low %v199_v62, %v199_v62 }
 0x1db   :  { %6328 = vmatprep.subr.bf16.mxu1 %v6971_v3  ;;  %v7019_v3 = vld [vmem:[#allocation5 + $0xc78] sm:$0xff]  }
 0x1dc   :  { %6307 = vmatpush3.bf16.msra.mxu0 %v6970_v2  ;;  %v7018_v2 = vld [vmem:[#allocation5 + $0xb80] sm:$0xff]  }
 0x1dd   :  { %6308 = vmatprep.subr.bf16.mxu0 %v6973_v5 }
 0x1de   :  { %6329 = vmatpush3.bf16.msra.mxu1 %v6972_v4 }
 0x1df   :  { %6330 = vmatprep.subr.bf16.mxu1 %v6975_v7 }
 0x1e0   :  { %6309 = vmatpush3.bf16.msra.mxu0 %v6974_v6  ;;  %v200_v6 = vld [vmem:[#allocation2 + $0xb8] sm:$0xff] }
 0x1e1   :  { %6310 = vmatprep.subr.bf16.mxu0 %v6977_v9  ;;  %v5390_v9 = vcombine.high %v200_v6, %v200_v6 }
 0x1e2   :  { %6331 = vmatpush3.bf16.msra.mxu1 %v6976_v8  ;;  %v5389_v8 = vcombine.low %v200_v6, %v200_v6  ;;  %v7059_v6 = vld [vmem:[#allocation5 + $0xd28] sm:$0xff]  }
 0x1e3   :  { %6332 = vmatprep.subr.bf16.mxu1 %v6979_v11 }
 0x1e4   :  { %6311 = vmatpush3.bf16.msra.mxu0 %v6978_v10  ;;  %v7022_v10 = vld [vmem:[#allocation5 + $0xc38] sm:$0xff]  }
 0x1e5   :  { %6340 = vmatprep.subr.bf16.mxu0 %v6983_v18 }
 0x1e6   :  { %6333 = vmatpush3.bf16.msra.mxu1 %v6982_v16  ;;  %v7024_v16 = vld [vmem:[#allocation5 + $0xcb8] sm:$0xff]  }
 0x1e7   :  { %v6048_v12 = vpop.f32.mrf.mxu0  ;;  %4622 = vmatmul.mubr.bf16.vlgmr.msra.gmra.mxu0 %v5383_v14  ;;  %6362 = vmatprep.subr.bf16.mxu1 %v6987_v27  ;;  %v7023_v14 = vld [vmem:[#allocation5 + $0xcf8] sm:$0xff]   ;;  %v7031_v27 = vld [vmem:[#allocation5 + $0xce8] sm:$0xff]  }
 0x1e8   :  { %6341 = vmatpush3.bf16.msra.mxu0 %v6986_v24  ;;  %4701 = vmatprep.mubr.bf16.mxu0 %v5388_v1  ;;  %v7028_v24 = vld [vmem:[#allocation5 + $0xcb0] sm:$0xff]  }
 0x1e9   :  { %v6049_v17 = vpop.f32.mrf.mxu0  ;;  %v6070_v21 = vpop.f32.mrf.mxu1  ;;  %4662 = vmatmul.mubr.bf16.vlgmr.msra.gmra.mxu1 %v5385_v22  ;;  %6342 = vmatprep.subr.bf16.mxu0 %v6989_v32  ;;  %v7036_v32 = vld [vmem:[#allocation5 + $0xca0] sm:$0xff]   ;;  %v7058_v1 = vld [vmem:[#allocation5 + $0xd30] sm:$0xff]  }
 0x1ea   :  { %v6050_v20 = vadd.f32 %v6049_v17, %v6048_v12  ;;  %6363 = vmatpush3.bf16.msra.mxu1 %v6988_v29  ;;  %4741 = vmatprep.mubr.bf16.mxu1 %v5390_v9  ;;  %v7033_v29 = vld [vmem:[#allocation5 + $0xc60] sm:$0xff]   ;;  %v7062_v9 = vld [vmem:[#allocation5 + $0xd10] sm:$0xff]  }
 0x1eb   :  { %v6051_v25 = vpop.f32.mrf.mxu0  ;;  %v6071_v28 = vpop.f32.mrf.mxu1  ;;  %6364 = vmatprep.subr.bf16.mxu1 %v6991_v36  ;;  %v7040_v36 = vld [vmem:[#allocation5 + $0xc98] sm:$0xff]  }
 0x1ec   :  { %v4144_v26 = vadd.f32 %v6050_v20, %v7485_v48  ;;  %v6072_v30 = vadd.f32 %v6071_v28, %v6070_v21  ;;  %6343 = vmatpush3.bf16.msra.mxu0 %v6990_v35  ;;  %v7002_v48 = vld [vmem:[#allocation5 + $0xb18] sm:$0xff]   ;;  %v7025_v20 = vld [vmem:[#allocation5 + $0xc70] sm:$0xff]   ;;  %v7029_v25 = vld [vmem:[#allocation5 + $0xc68] sm:$0xff]  }
 0x1ed   :  { %v6052_v31 = vpop.f32.mrf.mxu0  ;;  %v6073_v33 = vpop.f32.mrf.mxu1  ;;  %6344 = vmatprep.subr.bf16.mxu0 %v6993_v39  ;;  %v7026_v21 = vld [vmem:[#allocation5 + $0xc30] sm:$0xff]   ;;  %v7032_v28 = vld [vmem:[#allocation5 + $0xca8] sm:$0xff]   ;;  %v7039_v35 = vld [vmem:[#allocation5 + $0xcd8] sm:$0xff]  }
 0x1ee   :  { %v7488_v34 = vadd.f32 %v6072_v30, %v4144_v26  ;;  %6365 = vmatpush3.bf16.msra.mxu1 %v6992_v38  ;;  %v7030_v26 = vld [vmem:[#allocation5 + $0xc28] sm:$0xff]   ;;  %v7034_v30 = vld [vmem:[#allocation5 + $0xc20] sm:$0xff]   ;;  %v7037_v33 = vld [vmem:[#allocation5 + $0xc58] sm:$0xff]  }
 0x1ef   :  { %v6074_v37 = vpop.f32.mrf.mxu1  ;;  %6366 = vmatprep.subr.bf16.mxu1 %v6995_v41  ;;  %v7035_v31 = vld [vmem:[#allocation5 + $0xce0] sm:$0xff]   ;;  %v7042_v38 = vld [vmem:[#allocation5 + $0xc10] sm:$0xff]   ;;  %v7045_v41 = vld [vmem:[#allocation5 + $0xc48] sm:$0xff]  }
 0x1f0   :  { %6345 = vmatpush3.bf16.msra.mxu0 %v6994_v40  ;;  %v7041_v37 = vld [vmem:[#allocation5 + $0xc50] sm:$0xff]  }
 0x1f1   :  { %6346 = vmatprep.subr.bf16.mxu0 %v6997_v43  ;;  %v7043_v39 = vld [vmem:[#allocation5 + $0xcd0] sm:$0xff]   ;;  %v7047_v43 = vld [vmem:[#allocation5 + $0xcc8] sm:$0xff]  }
 0x1f2   :  { %6367 = vmatpush3.bf16.msra.mxu1 %v6996_v42  ;;  %v7044_v40 = vld [vmem:[#allocation5 + $0xc90] sm:$0xff]   ;;  %v7046_v42 = vld [vmem:[#allocation5 + $0xc08] sm:$0xff]  }
 0x1f3   :  { %6368 = vmatprep.subr.bf16.mxu1 %v6999_v45  ;;  %v7049_v45 = vld [vmem:[#allocation5 + $0xc40] sm:$0xff]  }
 0x1f4   :  { %6347 = vmatpush3.bf16.msra.mxu0 %v6998_v44  ;;  %v7048_v44 = vld [vmem:[#allocation5 + $0xc88] sm:$0xff]  }
 0x1f5   :  { %6348 = vmatprep.subr.bf16.mxu0 %v7001_v47  ;;  %v7051_v47 = vld [vmem:[#allocation5 + $0xcc0] sm:$0xff]  }
 0x1f6   :  { %6369 = vmatpush3.bf16.msra.mxu1 %v7000_v46  ;;  %v7050_v46 = vld [vmem:[#allocation5 + $0xc00] sm:$0xff]  }
 0x1f7   :  { %6370 = vmatprep.subr.bf16.mxu1 %v7003_v49 }
 0x1f8   :  { %6349 = vmatpush3.bf16.msra.mxu0 %v7002_v48  ;;  %v201_v48 = vld [vmem:[#allocation2 + $0xc0] sm:$0xff] }
 0x1f9   :  { %6350 = vmatprep.subr.bf16.mxu0 %v7005_v51  ;;  %v5392_v51 = vcombine.high %v201_v48, %v201_v48 }
 0x1fa   :  { %6371 = vmatpush3.bf16.msra.mxu1 %v7004_v50  ;;  %v5391_v50 = vcombine.low %v201_v48, %v201_v48 }
 0x1fb   :  { %6372 = vmatprep.subr.bf16.mxu1 %v7007_v53  ;;  %v202_v53 = vld [vmem:[#allocation2 + $0xc8] sm:$0xff] }
 0x1fc   :  { %6351 = vmatpush3.bf16.msra.mxu0 %v7006_v52  ;;  %v7054_v52 = vld [vmem:[#allocation5 + $0xc80] sm:$0xff]  }
 0x1fd   :  { %6352 = vmatprep.subr.bf16.mxu0 %v7009_v55  ;;  %v5393_v55 = vcombine.low %v202_v53, %v202_v53 }
 0x1fe   :  { %6373 = vmatpush3.bf16.msra.mxu1 %v7008_v54  ;;  %v7365_v54 = vmov 0.0  }
 0x1ff   :  { %6374 = vmatprep.subr.bf16.mxu1 %v7011_v57  ;;  %v7057_v57 = vld [vmem:[#allocation5 + $0xd38] sm:$0xff]  }
 0x200   :  { %6353 = vmatpush3.bf16.msra.mxu0 %v7010_v56  ;;  %v5394_v56 = vcombine.high %v202_v53, %v202_v53 }
 0x201   :  { %6354 = vmatprep.subr.bf16.mxu0 %v7013_v59 }
 0x202   :  { %6375 = vmatpush3.bf16.msra.mxu1 %v7012_v58 }
 0x203   :  { %6376 = vmatprep.subr.bf16.mxu1 %v7015_v61 }
 0x204   :  { %6355 = vmatpush3.bf16.msra.mxu0 %v7014_v60 }
 0x205   :  { %6384 = vmatprep.subr.bf16.mxu0 %v7019_v3 }
 0x206   :  { %6377 = vmatpush3.bf16.msra.mxu1 %v7018_v2 }
 0x207   :  { %v6092_v63 = vpop.f32.mrf.mxu0  ;;  %4702 = vmatmul.mubr.bf16.vlgmr.msra.gmra.mxu0 %v5387_v0  ;;  %6406 = vmatprep.subr.bf16.mxu1 %v7023_v14 }
 0x208   :  { %6385 = vmatpush3.bf16.msra.mxu0 %v7022_v10  ;;  %4781 = vmatprep.mubr.bf16.mxu0 %v5392_v51  ;;  %v7063_v10 = vld [vmem:[#allocation5 + $0xd08] sm:$0xff]  }
 0x209   :  { %v6093_v4 = vpop.f32.mrf.mxu0  ;;  %v6114_v5 = vpop.f32.mrf.mxu1  ;;  %4742 = vmatmul.mubr.bf16.vlgmr.msra.gmra.mxu1 %v5389_v8  ;;  %6386 = vmatprep.subr.bf16.mxu0 %v7025_v20  ;;  %v7061_v8 = vld [vmem:[#allocation5 + $0xd18] sm:$0xff]  }
 0x20a   :  { %v6094_v7 = vadd.f32 %v6093_v4, %v6092_v63  ;;  %6407 = vmatpush3.bf16.msra.mxu1 %v7024_v16  ;;  %4821 = vmatprep.mubr.bf16.mxu1 %v5394_v56 }
 0x20b   :  { %v6095_v11 = vpop.f32.mrf.mxu0  ;;  %v6115_v12 = vpop.f32.mrf.mxu1  ;;  %6408 = vmatprep.subr.bf16.mxu1 %v7027_v23 }
 0x20c   :  { %v4224_v13 = vadd.f32 %v6094_v7, %v7488_v34  ;;  %v6116_v15 = vadd.f32 %v6115_v12, %v6114_v5  ;;  %6387 = vmatpush3.bf16.msra.mxu0 %v7026_v21  ;;  %v7038_v34 = vld [vmem:[#allocation5 + $0xc18] sm:$0xff]   ;;  %v7060_v7 = vld [vmem:[#allocation5 + $0xd20] sm:$0xff]  }
 0x20d   :  { %v6096_v17 = vpop.f32.mrf.mxu0  ;;  %v6117_v18 = vpop.f32.mrf.mxu1  ;;  %6388 = vmatprep.subr.bf16.mxu0 %v7029_v25  ;;  %v7064_v11 = vld [vmem:[#allocation5 + $0xd00] sm:$0xff]   ;;  %v7065_v12 = vld [vmem:[#allocation2 + $0xd0] ss:$0 sps:$4 sm:$0xff]  }
 0x20e   :  { %v7491_v19 = vadd.f32 %v6116_v15, %v4224_v13  ;;  %6409 = vmatpush3.bf16.msra.mxu1 %v7028_v24 }
 0x20f   :  { %v6118_v22 = vpop.f32.mrf.mxu1  ;;  %6410 = vmatprep.subr.bf16.mxu1 %v7031_v27 }
 0x210   :  { %6389 = vmatpush3.bf16.msra.mxu0 %v7030_v26 }
 0x211   :  { %6390 = vmatprep.subr.bf16.mxu0 %v7033_v29 }
 0x212   :  { %6411 = vmatpush3.bf16.msra.mxu1 %v7032_v28 }
 0x213   :  { %6412 = vmatprep.subr.bf16.mxu1 %v7035_v31 }
 0x214   :  { %6391 = vmatpush3.bf16.msra.mxu0 %v7034_v30 }
 0x215   :  { %6392 = vmatprep.subr.bf16.mxu0 %v7037_v33 }
 0x216   :  { %6413 = vmatpush3.bf16.msra.mxu1 %v7036_v32 }
 0x217   :  { %6414 = vmatprep.subr.bf16.mxu1 %v7039_v35 }
 0x218   :  { %6393 = vmatpush3.bf16.msra.mxu0 %v7038_v34 }
 0x219   :  { %6394 = vmatprep.subr.bf16.mxu0 %v7041_v37  ;;  %v7066_v37 = vld [vmem:[#allocation8 + $0x38] sm:$0xff]  }
 0x21a   :  { %6415 = vmatpush3.bf16.msra.mxu1 %v7040_v36 }
 0x21b   :  { %6416 = vmatprep.subr.bf16.mxu1 %v7043_v39  ;;  %v7068_v39 = vld [vmem:[#allocation8 + $0x28] sm:$0xff]  }
 0x21c   :  { %6395 = vmatpush3.bf16.msra.mxu0 %v7042_v38  ;;  %v7067_v38 = vld [vmem:[#allocation8 + $0x30] sm:$0xff]  }
 0x21d   :  { %6396 = vmatprep.subr.bf16.mxu0 %v7045_v41  ;;  %v7070_v41 = vld [vmem:[#allocation8 + $0x18] sm:$0xff]  }
 0x21e   :  { %6417 = vmatpush3.bf16.msra.mxu1 %v7044_v40  ;;  %v7069_v40 = vld [vmem:[#allocation8 + $0x20] sm:$0xff]  }
 0x21f   :  { %6418 = vmatprep.subr.bf16.mxu1 %v7047_v43 }
 0x220   :  { %6397 = vmatpush3.bf16.msra.mxu0 %v7046_v42  ;;  %v7071_v42 = vld [vmem:[#allocation8 + $0x10] sm:$0xff]  }
 0x221   :  { %6398 = vmatprep.subr.bf16.mxu0 %v7049_v45 }
 0x222   :  { %6419 = vmatpush3.bf16.msra.mxu1 %v7048_v44  ;;  %v7072_v44 = vld [vmem:[#allocation8 + $0x8] sm:$0xff]  }
 0x223   :  { %6420 = vmatprep.subr.bf16.mxu1 %v7051_v47 }
 0x224   :  { %6399 = vmatpush3.bf16.msra.mxu0 %v7050_v46 }
 0x225   :  { %6473 = vmatprep.subr.bf16.mxu0 %v7365_v54 }
 0x226   :  { %6421 = vmatpush3.bf16.msra.mxu1 %v7054_v52 }
 0x227   :  { %v6136_v49 = vpop.f32.mrf.mxu0  ;;  %4782 = vmatmul.mubr.bf16.vlgmr.msra.gmra.mxu0 %v5391_v50  ;;  %6493 = vmatprep.subr.bf16.mxu1 %v7365_v54  ;;  %v7073_v50 = vld [vmem:[#allocation8] sm:$0xff]  }
 0x228   :  { %6474 = vmatpush3.bf16.msra.mxu0 %v7057_v57  ;;  %6489 = vmatprep.mubr.msk.bf16.mxu0 %vm7366_vm0, %v7365_v54 }
 0x229   :  { %v6137_v58 = vpop.f32.mrf.mxu0  ;;  %v6158_v59 = vpop.f32.mrf.mxu1  ;;  %4822 = vmatmul.mubr.bf16.vlgmr.msra.gmra.mxu1 %v5393_v55  ;;  %6475 = vmatprep.subr.bf16.mxu0 %v7365_v54 }
 0x22a   :  { %v6138_v60 = vadd.f32 %v6137_v58, %v6136_v49  ;;  %6509 = vmatprep.mubr.msk.bf16.mxu1 %vm7366_vm0, %v7365_v54  ;;  %6494 = vmatpush3.bf16.msra.mxu1 %v7066_v37  ;;  %v7074_v58 = vld [vmem:[#allocation11 + $0x38] sm:$0xff]  }
 0x22b   :  { %v6139_v61 = vpop.f32.mrf.mxu0  ;;  %v6159_v62 = vpop.f32.mrf.mxu1  ;;  %6495 = vmatprep.subr.bf16.mxu1 %v7365_v54 }
 0x22c   :  { %v4304_v63 = vadd.f32 %v6138_v60, %v7491_v19  ;;  %v6160_v0 = vadd.f32 %v6159_v62, %v6158_v59  ;;  %6476 = vmatpush3.bf16.msra.mxu0 %v7058_v1  ;;  %v7075_v59 = vld [vmem:[#allocation11 + $0x30] sm:$0xff]   ;;  %v7076_v60 = vld [vmem:[#allocation11 + $0x28] sm:$0xff]   ;;  %v7077_v61 = vld [vmem:[#allocation11 + $0x20] sm:$0xff]  }
 0x22d   :  { %v6140_v2 = vpop.f32.mrf.mxu0  ;;  %v6161_v3 = vpop.f32.mrf.mxu1  ;;  %6477 = vmatprep.subr.bf16.mxu0 %v7365_v54  ;;  %v7078_v62 = vld [vmem:[#allocation11 + $0x18] sm:$0xff]  }
 0x22e   :  { %v4344_v4 = vadd.f32 %v6160_v0, %v4304_v63  ;;  %6496 = vmatpush3.bf16.msra.mxu1 %v7067_v38  ;;  %v7079_v63 = vld [vmem:[#allocation11 + $0x10] sm:$0xff]  }
 0x22f   :  { %v6162_v5 = vpop.f32.mrf.mxu1  ;;  %6497 = vmatprep.subr.bf16.mxu1 %v7365_v54 }
 0x230   :  { %6478 = vmatpush3.bf16.msra.mxu0 %v7059_v6 }
 0x231   :  { %6479 = vmatprep.subr.bf16.mxu0 %v7365_v54 }
 0x232   :  { %6498 = vmatpush3.bf16.msra.mxu1 %v7068_v39 }
 0x233   :  { %6499 = vmatprep.subr.bf16.mxu1 %v7365_v54 }
 0x234   :  { %6480 = vmatpush3.bf16.msra.mxu0 %v7060_v7 }
 0x235   :  { %6481 = vmatprep.subr.bf16.mxu0 %v7365_v54 }
 0x236   :  { %6500 = vmatpush3.bf16.msra.mxu1 %v7069_v40 }
 0x237   :  { %6501 = vmatprep.subr.bf16.mxu1 %v7365_v54 }
 0x238   :  { %6482 = vmatpush3.bf16.msra.mxu0 %v7061_v8 }
 0x239   :  { %6483 = vmatprep.subr.bf16.mxu0 %v7365_v54 }
 0x23a   :  { %6502 = vmatpush3.bf16.msra.mxu1 %v7070_v41 }
 0x23b   :  { %6503 = vmatprep.subr.bf16.mxu1 %v7365_v54 }
 0x23c   :  { %6484 = vmatpush3.bf16.msra.mxu0 %v7062_v9 }
 0x23d   :  { %6485 = vmatprep.subr.bf16.mxu0 %v7365_v54 }
 0x23e   :  { %6504 = vmatpush3.bf16.msra.mxu1 %v7071_v42 }
 0x23f   :  { %6505 = vmatprep.subr.bf16.mxu1 %v7365_v54 }
 0x240   :  { %6486 = vmatpush3.bf16.msra.mxu0 %v7063_v10 }
 0x241   :  { %6487 = vmatprep.subr.bf16.mxu0 %v7365_v54 }
 0x242   :  { %6506 = vmatpush3.bf16.msra.mxu1 %v7072_v44  ;;  %v7081_v44 = vld [vmem:[#allocation11] sm:$0xff]  }
 0x243   :  { %6507 = vmatprep.subr.bf16.mxu1 %v7365_v54 }
 0x244   :  { %6488 = vmatpush3.bf16.msra.mxu0 %v7064_v11 }
 0x245   :  { %6513 = vmatprep.subr.bf16.mxu0 %v7365_v54 }
 0x246   :  { %6508 = vmatpush3.bf16.msra.mxu1 %v7073_v50  ;;  %v7087_v50 = vld [vmem:[#allocation14 + $0x10] sm:$0xff]  }
 0x247   :  { %v6180_v13 = vpop.f32.mrf.mxu0  ;;  %6490 = vmatmul.mubr.bf16.vlgmr.msra.gmra.mxu0 %v7065_v12  ;;  %6533 = vmatprep.subr.bf16.mxu1 %v7365_v54 }
 0x248   :  { %6529 = vmatprep.mubr.msk.bf16.mxu0 %vm7366_vm0, %v7365_v54  ;;  %6514 = vmatpush3.bf16.msra.mxu0 %v7074_v58 }
 0x249   :  { %v6181_v14 = vpop.f32.mrf.mxu0  ;;  %v6202_v15 = vpop.f32.mrf.mxu1  ;;  %6515 = vmatprep.subr.bf16.mxu0 %v7365_v54 }
 0x24a   :  { %v6182_v16 = vadd.f32 %v6181_v14, %v6180_v13 }
 0x24b   :  { %v6183_v17 = vpop.f32.mrf.mxu0  ;;  %v6203_v18 = vpop.f32.mrf.mxu1 }
 0x24c   :  { %v4384_v19 = vadd.f32 %v6182_v16, %v4344_v4  ;;  %v6204_v20 = vadd.f32 %v6203_v18, %v6202_v15  ;;  %6516 = vmatpush3.bf16.msra.mxu0 %v7075_v59 }
 0x24d   :  { %v6184_v21 = vpop.f32.mrf.mxu0  ;;  %v6205_v22 = vpop.f32.mrf.mxu1  ;;  %6517 = vmatprep.subr.bf16.mxu0 %v7365_v54 }
 0x24e   :  { %v4424_v23 = vadd.f32 %v6204_v20, %v4384_v19 }
 0x24f   :  { %v6206_v24 = vpop.f32.mrf.mxu1 }
 0x250   :  { %6518 = vmatpush3.bf16.msra.mxu0 %v7076_v60  ;;  %v7088_v60 = vld [vmem:[#allocation14 + $0x8] sm:$0xff]  }
 0x251   :  { %6519 = vmatprep.subr.bf16.mxu0 %v7365_v54 }
 0x254   :  { %6520 = vmatpush3.bf16.msra.mxu0 %v7077_v61  ;;  %v7089_v61 = vld [vmem:[#allocation14] sm:$0xff]  }
 0x255   :  { %6521 = vmatprep.subr.bf16.mxu0 %v7365_v54 }
 0x258   :  { %6522 = vmatpush3.bf16.msra.mxu0 %v7078_v62  ;;  %v7090_v62 = vld [vmem:[#allocation17 + $0x38] sm:$0xff]  }
 0x259   :  { %6523 = vmatprep.subr.bf16.mxu0 %v7365_v54 }
 0x25c   :  { %6524 = vmatpush3.bf16.msra.mxu0 %v7079_v63  ;;  %v7091_v63 = vld [vmem:[#allocation17 + $0x30] sm:$0xff]  }
 0x25d   :  { %6525 = vmatprep.subr.bf16.mxu0 %v7365_v54 }
 0x267   :  { %v6224_v25 = vpop.f32.mrf.mxu0 }
 0x269   :  { %v6225_v26 = vpop.f32.mrf.mxu0  ;;  %v6246_v28 = vpop.f32.mrf.mxu1 }
 0x26a   :  { %v6226_v27 = vadd.f32 %v6225_v26, %v6224_v25 }
 0x26b   :  { %v6227_v29 = vpop.f32.mrf.mxu0  ;;  %v6247_v31 = vpop.f32.mrf.mxu1 }
 0x26c   :  { %v4464_v30 = vadd.f32 %v6226_v27, %v4424_v23  ;;  %v6248_v32 = vadd.f32 %v6247_v31, %v6246_v28 }
 0x26d   :  { %v6228_v33 = vpop.f32.mrf.mxu0  ;;  %v6249_v34 = vpop.f32.mrf.mxu1 }
 0x26e   :  { %v4504_v35 = vadd.f32 %v6248_v32, %v4464_v30 }
 0x26f   :  { %v6250_v36 = vpop.f32.mrf.mxu1 }
 0x287   :  { %v6268_v43 = vpop.f32.mrf.mxu0 }
 0x289   :  { %v6269_v45 = vpop.f32.mrf.mxu0  ;;  %v6290_v46 = vpop.f32.mrf.mxu1 }
 0x28a   :  { %v6270_v47 = vadd.f32 %v6269_v45, %v6268_v43  ;;  %v7080_v43 = vld [vmem:[#allocation11 + $0x8] sm:$0xff]   ;;  %v7082_v45 = vld [vmem:[#allocation14 + $0x38] sm:$0xff]  }
 0x28b   :  { %v6271_v48 = vpop.f32.mrf.mxu0  ;;  %v6291_v49 = vpop.f32.mrf.mxu1  ;;  %6526 = vmatpush3.bf16.msra.mxu0 %v7080_v43 }
 0x28c   :  { %v4544_v51 = vadd.f32 %v6270_v47, %v4504_v35  ;;  %v6292_v52 = vadd.f32 %v6291_v49, %v6290_v46  ;;  %6527 = vmatprep.subr.bf16.mxu0 %v7365_v54  ;;  %v7083_v46 = vld [vmem:[#allocation14 + $0x30] sm:$0xff]   ;;  %v7084_v47 = vld [vmem:[#allocation14 + $0x28] sm:$0xff]   ;;  %v7085_v48 = vld [vmem:[#allocation14 + $0x20] sm:$0xff]  }
 0x28d   :  { %v6272_v53 = vpop.f32.mrf.mxu0  ;;  %v6293_v55 = vpop.f32.mrf.mxu1  ;;  %v7086_v49 = vld [vmem:[#allocation14 + $0x18] sm:$0xff]  }
 0x28e   :  { %v4584_v56 = vadd.f32 %v6292_v52, %v4544_v51  ;;  %v5820_v51 = vld [vmem:[#allocation10] ss:$0 sm:$0xff] }
 0x28f   :  { %v6294_v57 = vpop.f32.mrf.mxu1  ;;  %6528 = vmatpush3.bf16.msra.mxu0 %v7081_v44 }
 0x290   :  { %6553 = vmatprep.subr.bf16.mxu0 %v7365_v54 }
 0x2a7   :  { %v6312_v0 = vpop.f32.mrf.mxu0 }
 0x2a9   :  { %v6313_v1 = vpop.f32.mrf.mxu0  ;;  %v6334_v2 = vpop.f32.mrf.mxu1 }
 0x2aa   :  { %v6314_v3 = vadd.f32 %v6313_v1, %v6312_v0  ;;  %v7092_v0 = vld [vmem:[#allocation17 + $0x28] sm:$0xff]   ;;  %v7093_v1 = vld [vmem:[#allocation17 + $0x20] sm:$0xff]  }
 0x2ab   :  { %v6315_v4 = vpop.f32.mrf.mxu0  ;;  %v6335_v5 = vpop.f32.mrf.mxu1 }
 0x2ac   :  { %v4624_v6 = vadd.f32 %v6314_v3, %v4584_v56  ;;  %v6336_v7 = vadd.f32 %v6335_v5, %v6334_v2  ;;  %v7094_v2 = vld [vmem:[#allocation17 + $0x18] sm:$0xff]   ;;  %v7095_v3 = vld [vmem:[#allocation17 + $0x10] sm:$0xff]  }
 0x2ad   :  { %v6316_v8 = vpop.f32.mrf.mxu0  ;;  %v6337_v9 = vpop.f32.mrf.mxu1  ;;  %v5829_v4 = vld [vmem:[#allocation13] ss:$0 sm:$0xff] }
 0x2ae   :  { %v4664_v10 = vadd.f32 %v6336_v7, %v4624_v6 }
 0x2af   :  { %v6338_v11 = vpop.f32.mrf.mxu1 }
 0x2c7   :  { %v6356_v12 = vpop.f32.mrf.mxu0 }
 0x2c9   :  { %v6357_v13 = vpop.f32.mrf.mxu0  ;;  %v6378_v14 = vpop.f32.mrf.mxu1 }
 0x2ca   :  { %v6358_v28 = vadd.f32 %v6357_v13, %v6356_v12  ;;  %v7096_v12 = vld [vmem:[#allocation17 + $0x8] sm:$0xff]   ;;  %v7097_v13 = vld [vmem:[#allocation17] sm:$0xff]  }
 0x2cb   :  { %v6359_v15 = vpop.f32.mrf.mxu0  ;;  %v6379_v16 = vpop.f32.mrf.mxu1 }
 0x2cc   :  { %v4704_v29 = vadd.f32 %v6358_v28, %v4664_v10  ;;  %v6380_v30 = vadd.f32 %v6379_v16, %v6378_v14  ;;  %v5838_v14 = vld [vmem:[#allocation16] ss:$0 sm:$0xff] }
 0x2cd   :  { %v6360_v17 = vpop.f32.mrf.mxu0  ;;  %v6381_v18 = vpop.f32.mrf.mxu1 }
 0x2ce   :  { %v4744_v32 = vadd.f32 %v6380_v30, %v4704_v29 }
 0x2cf   :  { %v6382_v19 = vpop.f32.mrf.mxu1 }
 0x2e7   :  { %v6400_v20 = vpop.f32.mrf.mxu0 }
 0x2e9   :  { %v6401_v21 = vpop.f32.mrf.mxu0  ;;  %v6422_v22 = vpop.f32.mrf.mxu1 }
 0x2ea   :  { %v6402_v31 = vadd.f32 %v6401_v21, %v6400_v20 }
 0x2eb   :  { %v6403_v23 = vpop.f32.mrf.mxu0  ;;  %v6423_v24 = vpop.f32.mrf.mxu1 }
 0x2ec   :  { %v4784_v33 = vadd.f32 %v6402_v31, %v4744_v32  ;;  %v6424_v34 = vadd.f32 %v6423_v24, %v6422_v22  ;;  %v5847_v22 = vld [vmem:[#allocation19] ss:$0 sm:$0xff] }
 0x2ed   :  { %v6404_v25 = vpop.f32.mrf.mxu0  ;;  %v6425_v26 = vpop.f32.mrf.mxu1 }
 0x2ee   :  { %v4824_v35 = vadd.f32 %v6424_v34, %v4784_v33 }
 0x2ef   :  { %v6426_v27 = vpop.f32.mrf.mxu1 }
 0x307   :  { %v4863_v36 = vpop.f32.mrf.mxu0 }
 0x308   :  { %v4864_v37 = vadd.f32 %v4863_v36, %v4824_v35 }
 0x309   :  { %v6491_v38 = vpop.f32.mrf.mxu0 }
 0x30a   :  { %v4869_v39 = vmax.f32 %v4864_v37, 0.0 }
 0x30b   :  { %v4866_v40 = vpop.f32.mrf.mxu0 }
 0x30c   :  { %v4870_v41 = vpack.c.bf16 %v4869_v39, %v4869_v39 }
 0x30d   :  { %v6492_v42 = vpop.f32.mrf.mxu0 }
 0x30e   :  { %6510 = vmatmul.mubr.bf16.vlgmr.msra.gmra.mxu1 %v4870_v41 }
 0x30f   :  { %6549 = vmatprep.mubr.msk.bf16.mxu1 %vm7366_vm0, %v7365_v54  ;;  %6534 = vmatpush3.bf16.msra.mxu1 %v7082_v45 }
 0x310   :  { %6535 = vmatprep.subr.bf16.mxu1 %v7365_v54 }
 0x313   :  { %6536 = vmatpush3.bf16.msra.mxu1 %v7083_v46 }
 0x314   :  { %6537 = vmatprep.subr.bf16.mxu1 %v7365_v54 }
 0x317   :  { %6538 = vmatpush3.bf16.msra.mxu1 %v7084_v47 }
 0x318   :  { %6539 = vmatprep.subr.bf16.mxu1 %v7365_v54 }
 0x31b   :  { %6540 = vmatpush3.bf16.msra.mxu1 %v7085_v48 }
 0x31c   :  { %6541 = vmatprep.subr.bf16.mxu1 %v7365_v54 }
 0x31f   :  { %6542 = vmatpush3.bf16.msra.mxu1 %v7086_v49 }
 0x320   :  { %6543 = vmatprep.subr.bf16.mxu1 %v7365_v54 }
 0x323   :  { %6544 = vmatpush3.bf16.msra.mxu1 %v7087_v50 }
 0x324   :  { %6545 = vmatprep.subr.bf16.mxu1 %v7365_v54 }
 0x327   :  { %6546 = vmatpush3.bf16.msra.mxu1 %v7088_v60 }
 0x328   :  { %6547 = vmatprep.subr.bf16.mxu1 %v7365_v54 }
 0x32b   :  { %6548 = vmatpush3.bf16.msra.mxu1 %v7089_v61 }
 0x3ce   :  { %v4976_v52 = vpop.f32.mrf.mxu1 }
 0x3cf   :  { %v4977_v53 = vadd.f32 %v5820_v51, %v4976_v52 }
 0x3d0   :  { %v6511_v55 = vpop.f32.mrf.mxu1 }
 0x3d1   :  { %v4982_v56 = vmax.f32 %v4977_v53, 0.0 }
 0x3d2   :  { %v4979_v57 = vpop.f32.mrf.mxu1 }
 0x3d3   :  { %v4983_v58 = vpack.c.bf16 %v4982_v56, %v4982_v56 }
 0x3d4   :  { %v6512_v59 = vpop.f32.mrf.mxu1 }
 0x3d5   :  { %6530 = vmatmul.mubr.bf16.vlgmr.msra.gmra.mxu0 %v4983_v58 }
 0x3d6   :  { %6569 = vmatprep.mubr.msk.bf16.mxu0 %vm7366_vm0, %v7365_v54  ;;  %6554 = vmatpush3.bf16.msra.mxu0 %v7090_v62 }
 0x3d7   :  { %6555 = vmatprep.subr.bf16.mxu0 %v7365_v54 }
 0x3da   :  { %6556 = vmatpush3.bf16.msra.mxu0 %v7091_v63 }
 0x3db   :  { %6557 = vmatprep.subr.bf16.mxu0 %v7365_v54 }
 0x3de   :  { %6558 = vmatpush3.bf16.msra.mxu0 %v7092_v0 }
 0x3df   :  { %6559 = vmatprep.subr.bf16.mxu0 %v7365_v54 }
 0x3e2   :  { %6560 = vmatpush3.bf16.msra.mxu0 %v7093_v1 }
 0x3e3   :  { %6561 = vmatprep.subr.bf16.mxu0 %v7365_v54 }
 0x3e6   :  { %6562 = vmatpush3.bf16.msra.mxu0 %v7094_v2 }
 0x3e7   :  { %6563 = vmatprep.subr.bf16.mxu0 %v7365_v54 }
 0x3ea   :  { %6564 = vmatpush3.bf16.msra.mxu0 %v7095_v3 }
 0x3eb   :  { %6565 = vmatprep.subr.bf16.mxu0 %v7365_v54 }
 0x3ee   :  { %6566 = vmatpush3.bf16.msra.mxu0 %v7096_v12 }
 0x3ef   :  { %6567 = vmatprep.subr.bf16.mxu0 %v7365_v54 }
 0x3f2   :  { %6568 = vmatpush3.bf16.msra.mxu0 %v7097_v13 }
 0x495   :  { %v5089_v5 = vpop.f32.mrf.mxu0 }
 0x496   :  { %v5090_v6 = vadd.f32 %v5829_v4, %v5089_v5 }
 0x497   :  { %v6531_v7 = vpop.f32.mrf.mxu0 }
 0x498   :  { %v5095_v8 = vmax.f32 %v5090_v6, 0.0 }
 0x499   :  { %v5092_v9 = vpop.f32.mrf.mxu0 }
 0x49a   :  { %v5096_v10 = vpack.c.bf16 %v5095_v8, %v5095_v8 }
 0x49b   :  { %v6532_v11 = vpop.f32.mrf.mxu0 }
 0x49c   :  { %6550 = vmatmul.mubr.bf16.vlgmr.msra.gmra.mxu1 %v5096_v10 }
 0x55c   :  { %v5202_v15 = vpop.f32.mrf.mxu1 }
 0x55d   :  { %v5203_v16 = vadd.f32 %v5838_v14, %v5202_v15 }
 0x55e   :  { %v6551_v17 = vpop.f32.mrf.mxu1 }
 0x55f   :  { %v5208_v18 = vmax.f32 %v5203_v16, 0.0 }
 0x560   :  { %v5205_v19 = vpop.f32.mrf.mxu1 }
 0x561   :  { %v5209_v20 = vpack.c.bf16 %v5208_v18, %v5208_v18 }
 0x562   :  { %v6552_v21 = vpop.f32.mrf.mxu1 }
 0x563   :  { %6570 = vmatmul.mubr.bf16.vlgmr.msra.gmra.mxu0 %v5209_v20 }
 0x623   :  { %v5315_v23 = vpop.f32.mrf.mxu0 }
 0x624   :  { %v5316_v24 = vadd.f32 %v5847_v22, %v5315_v23 }
 0x625   :  { %v6571_v25 = vpop.f32.mrf.mxu0 }
 0x626   :  { %5321 = vst [vmem:[#allocation20] sm:$0xff] %v5316_v24 }
 0x627   :  { %v5318_v54 = vpop.f32.mrf.mxu0 }
 0x628   :  { %7329 = shalt.err (!%p7326_p3)
}
 0x629   :  { %5331 = dma.vmem_to_hbm [thread:$0]  %s5329_s10, 128, %s7558_s11, [#allocation4]   ;;  %v6572_v26 = vpop.f32.mrf.mxu0 }
 0x62a   :  { %7350 = dma.done.wait [#allocation4], 128  }
 0x62b   :  { %7351 = vsyncadd [#allocation4], 4294967168 }
 0x62c   :  { %5335 = vsyncpa [#allocation3], 1 }
 0x62d   :  { %5336 = vsyncpa [#allocation6], 1 }
 0x62e   :  { %5337 = vsyncpa [#allocation9], 1 }
 0x62f   :  { %5338 = vsyncpa [#allocation12], 1 }
 0x630   :  { %5339 = vsyncpa [#allocation15], 1 }
 0x631   :  { %5340 = vsyncpa [#allocation18], 1 }
 0x632   :  { %5341 = vsyncpa [#allocation4], 1 }

</bundles_post_ra>
